<compile_context>
chip_gen: v6e
topology: v6e:2x2x1
jax: 0.10.0
libtpu: 0.0.40
codegen_flags: <defaults>
</compile_context>

<pallas_src>
import jax
import jax.numpy as jnp
from jax import lax
from jax.experimental import pallas as pl
from jax.experimental.pallas import tpu as pltpu


def _projected_lstm_kernel(
    x_ref,      # (T*Bp, H)   time-major input, batch padded to Bp rows/step
    h0_ref,     # (Bp, L)     initial hidden state
    c0_ref,     # (Bp, L)     initial cell state
    wxg_ref,    # (H, 4L)     folded down-proj @ input->gate weight (i,f,o,g)
    bg_ref,     # (1, 4L)     folded gate bias (bd@Wih + b_ih + b_hh), (i,f,o,g)
    whh_ref,    # (L, 4L)     hidden->gate weight (i,f,o,g)
    wu_ref,     # (L, H)      up-projection weight
    bu_ref,     # (1, H)      up-projection bias
    y_ref,      # (T*Bp, H)   output (time-major, padded batch)
    hn_ref,     # (Bp, L)     final hidden state (f32)
    cn_ref,     # (Bp, L)     final cell state (f32)
    gx_scr,     # (T*Bp, 4L)  f32 scratch: input contribution to the gates
    h_all_scr,  # (T*Bp, L)   f32 scratch: per-step hidden states
):
    TB, _ = x_ref.shape
    Bp, L = h0_ref.shape
    T = TB // Bp

    # ---- hoisted: input contribution to all gates, all timesteps, 1 matmul ----
    gx_scr[...] = (
        jnp.dot(x_ref[...].astype(jnp.float32), wxg_ref[...],
                preferred_element_type=jnp.float32)
        + bg_ref[...]
    )

    whh = whh_ref[...]  # hoist weight load out of the loop

    # ---- serial recurrence: h/c carried as register values, fully unrolled ----
    def step(t, carry):
        h, c = carry
        row = pl.multiple_of(t * Bp, Bp)
        gates = gx_scr[pl.ds(row, Bp), :] + jnp.dot(
            h, whh, preferred_element_type=jnp.float32)        # (Bp, 4L)
        sig = jax.nn.sigmoid(gates[:, : 3 * L])                 # i | f | o
        i_g = sig[:, 0 * L:1 * L]
        f_g = sig[:, 1 * L:2 * L]
        o_g = sig[:, 2 * L:3 * L]
        g_g = jnp.tanh(gates[:, 3 * L:])
        c_new = f_g * c + i_g * g_g
        h_new = o_g * jnp.tanh(c_new)
        h_all_scr[pl.ds(row, Bp), :] = h_new
        return h_new, c_new

    h_fin, c_fin = lax.fori_loop(
        0, T, step,
        (h0_ref[...].astype(jnp.float32), c0_ref[...].astype(jnp.float32)),
        unroll=True)

    hn_ref[...] = h_fin
    cn_ref[...] = c_fin

    # ---- hoisted: up-projection of the whole hidden sequence in one matmul ----
    y_ref[...] = (
        jnp.dot(h_all_scr[...], wu_ref[...], preferred_element_type=jnp.float32)
        + bu_ref[...]
    ).astype(y_ref.dtype)


def projected_lstm_pallas(x, state_in, wd, bd, wih, whh, b_ih, b_hh, wu, bu):
    """Forward pass of ProjectedLSTM.

    Args:
      x:        (B, T, H) input sequence (batch_first, like the PyTorch module).
      state_in: (h0, c0), each (1, B, L)  (num_layers = 1, PyTorch convention).
      wd/bd:    down projection, already transposed: y = x @ wd + bd, wd (H, L).
      wih/whh:  LSTM weights, transposed: gates = x @ wih + h @ whh, each (L, 4L),
                gate order i, f, g, o (PyTorch convention).
      b_ih/b_hh: LSTM biases, each (4L,).
      wu/bu:    up projection, wu (L, H), bu (H,).

    Returns:
      (y, (h_n, c_n)) with y (B, T, H), h_n / c_n (1, B, L) float32.
    """
    B, T, H = x.shape
    h0, c0 = state_in
    L = h0.shape[-1]
    Bp = ((B + 7) // 8) * 8          # pad batch to a sublane multiple

    f32 = jnp.float32

    # Reorder gate columns (i, f, g, o) -> (i, f, o, g): contiguous sigmoid block.
    def perm(w):
        return jnp.concatenate(
            [w[..., : 2 * L], w[..., 3 * L:], w[..., 2 * L: 3 * L]], axis=-1)

    wih_p = perm(wih.astype(f32))
    whh_p = perm(whh.astype(f32))
    b_p = perm((b_ih + b_hh).astype(f32))[None, :]              # (1, 4L)

    # Fold the down projection into the input->gate path (cuDNN-style).
    # TODO(synk): the fold performs the down-projection in f32; for non-f32
    # inputs PyTorch would round xp to x.dtype before the LSTM `.float()` cast.
    hp = lax.Precision.HIGHEST
    wxg = jnp.dot(wd.astype(f32), wih_p, precision=hp)           # (H, 4L)
    bg = jnp.dot(bd.astype(f32)[None, :], wih_p, precision=hp) + b_p  # (1, 4L)

    # Time-major layout, batch padded to Bp, flattened to 2-D for the kernel.
    x_tm = jnp.transpose(x, (1, 0, 2))                           # (T, B, H)
    x_tm = jnp.pad(x_tm, ((0, 0), (0, Bp - B), (0, 0)))
    x2d = x_tm.reshape(T * Bp, H)

    h0p = jnp.pad(h0[0].astype(f32), ((0, Bp - B), (0, 0)))
    c0p = jnp.pad(c0[0].astype(f32), ((0, Bp - B), (0, 0)))
    bu2 = bu.astype(f32).reshape(1, H)

    vmem = pl.BlockSpec(memory_space=pltpu.MemorySpace.VMEM)

    y2d, h_n, c_n = pl.pallas_call(
        _projected_lstm_kernel,
        out_shape=(
            jax.ShapeDtypeStruct((T * Bp, H), x.dtype),
            jax.ShapeDtypeStruct((Bp, L), f32),
            jax.ShapeDtypeStruct((Bp, L), f32),
        ),
        in_specs=[vmem] * 8,
        out_specs=(vmem, vmem, vmem),
        scratch_shapes=[
            pltpu.VMEM((T * Bp, 4 * L), f32),   # gates_x for all timesteps
            pltpu.VMEM((T * Bp, L), f32),       # per-step hidden states
        ],
    )(x2d, h0p, c0p, wxg, bg, whh_p, wu.astype(f32), bu2)

    y = jnp.transpose(y2d.reshape(T, Bp, H)[:, :B, :], (1, 0, 2))   # (B, T, H)
    return y, (h_n[:B][None], c_n[:B][None])


def _projected_lstm_reference(x, state_in, wd, bd, wih, whh, b_ih, b_hh, wu, bu):
    """Pure-JAX reference matching the PyTorch module semantics."""
    hp = lax.Precision.HIGHEST
    h0, c0 = state_in
    xp = jnp.dot(x.astype(jnp.float32), wd, precision=hp) + bd   # (B, T, L)
    B, T, L = xp.shape
    h = h0[0].astype(jnp.float32)
    c = c0[0].astype(jnp.float32)
    ys = []
    for t in range(T):
        gates = (
            jnp.dot(xp[:, t, :], wih, precision=hp)
            + jnp.dot(h, whh, precision=hp)
            + b_ih + b_hh
        )
        i_g = jax.nn.sigmoid(gates[:, 0 * L:1 * L])
        f_g = jax.nn.sigmoid(gates[:, 1 * L:2 * L])
        g_g = jnp.tanh(gates[:, 2 * L:3 * L])
        o_g = jax.nn.sigmoid(gates[:, 3 * L:4 * L])
        c = f_g * c + i_g * g_g
        h = o_g * jnp.tanh(c)
        ys.append(jnp.dot(h, wu, precision=hp) + bu)
    y = jnp.stack(ys, axis=1).astype(x.dtype)                    # (B, T, H)
    return y, (h[None], c[None])


if __name__ == "__main__":
    B, T, H, L = 2, 8, 256, 128   # batch, seq, hidden_size, lstm_size

    key = jax.random.PRNGKey(0)
    ks = jax.random.split(key, 11)
    x = jax.random.normal(ks[0], (B, T, H), jnp.float32)
    h0 = jax.random.normal(ks[1], (1, B, L), jnp.float32) * 0.1
    c0 = jax.random.normal(ks[2], (1, B, L), jnp.float32) * 0.1

    wd = jax.random.normal(ks[3], (H, L), jnp.float32) * (H ** -0.5)
    bd = jax.random.normal(ks[4], (L,), jnp.float32) * 0.05
    wih = jax.random.normal(ks[5], (L, 4 * L), jnp.float32) * (L ** -0.5)
    whh = jax.random.normal(ks[6], (L, 4 * L), jnp.float32) * (L ** -0.5)
    b_ih = jax.random.normal(ks[7], (4 * L,), jnp.float32) * 0.05
    b_hh = jax.random.normal(ks[8], (4 * L,), jnp.float32) * 0.05
    wu = jax.random.normal(ks[9], (L, H), jnp.float32) * (L ** -0.5)
    bu = jax.random.normal(ks[10], (H,), jnp.float32) * 0.05

    y, (h_n, c_n) = projected_lstm_pallas(
        x, (h0, c0), wd, bd, wih, whh, b_ih, b_hh, wu, bu
    )
    y = jax.block_until_ready(y)

    y_ref, (h_ref, c_ref) = _projected_lstm_reference(
        x, (h0, c0), wd, bd, wih, whh, b_ih, b_hh, wu, bu
    )

    assert y.shape == (B, T, H) and y.dtype == x.dtype, (y.shape, y.dtype)
    assert h_n.shape == (1, B, L) and c_n.shape == (1, B, L)
    assert jnp.allclose(y, y_ref, rtol=1e-3, atol=1e-3), "output mismatch"
    assert jnp.allclose(h_n, h_ref, rtol=1e-3, atol=1e-3), "h_n mismatch"
    assert jnp.allclose(c_n, c_ref, rtol=1e-3, atol=1e-3), "c_n mismatch"

    print("KERNEL_OK")
</pallas_src>

<mosaic_0001>
module attributes {stable_mosaic.version = 11 : i64} {
  func.func @_projected_lstm_kernel(%arg0: memref<64x256xf32, #tpu.memory_space<vmem>>, %arg1: memref<8x128xf32, #tpu.memory_space<vmem>>, %arg2: memref<8x128xf32, #tpu.memory_space<vmem>>, %arg3: memref<256x512xf32, #tpu.memory_space<vmem>>, %arg4: memref<1x512xf32, #tpu.memory_space<vmem>>, %arg5: memref<128x512xf32, #tpu.memory_space<vmem>>, %arg6: memref<128x256xf32, #tpu.memory_space<vmem>>, %arg7: memref<1x256xf32, #tpu.memory_space<vmem>>, %arg8: memref<64x256xf32, #tpu.memory_space<vmem>>, %arg9: memref<8x128xf32, #tpu.memory_space<vmem>>, %arg10: memref<8x128xf32, #tpu.memory_space<vmem>>, %arg11: memref<64x512xf32, #tpu.memory_space<vmem>>, %arg12: memref<64x128xf32, #tpu.memory_space<vmem>>) attributes {dimension_semantics = [], scalar_prefetch = 0 : i64, scratch_operands = 2 : i64, tpu.core_type = #tpu.core_type<tc>} {
    %c0 = arith.constant 0 : index
    %c0_0 = arith.constant 0 : index
    %0 = vector.load %arg0[%c0, %c0_0] : memref<64x256xf32, #tpu.memory_space<vmem>>, vector<64x256xf32>
    %c0_1 = arith.constant 0 : index
    %c0_2 = arith.constant 0 : index
    %1 = vector.load %arg3[%c0_1, %c0_2] : memref<256x512xf32, #tpu.memory_space<vmem>>, vector<256x512xf32>
    %cst = arith.constant dense<0.000000e+00> : vector<64x512xf32>
    %2 = tpu.matmul %0, %1, %cst {dimension_numbers = #tpu.dot_dimension_numbers<[1], [0], [0], [1], [0, 0, 1, 1], [], []>} : vector<64x256xf32>, vector<256x512xf32>, vector<64x512xf32> -> vector<64x512xf32>
    %c0_3 = arith.constant 0 : index
    %c0_4 = arith.constant 0 : index
    %3 = vector.load %arg4[%c0_3, %c0_4] : memref<1x512xf32, #tpu.memory_space<vmem>>, vector<1x512xf32>
    %4 = vector.broadcast %3 : vector<1x512xf32> to vector<64x512xf32>
    %5 = arith.addf %2, %4 : vector<64x512xf32>
    %c0_5 = arith.constant 0 : index
    %c0_6 = arith.constant 0 : index
    %6 = vector.load %arg11[%c0_5, %c0_6] : memref<64x512xf32, #tpu.memory_space<vmem>>, vector<64x512xf32>
    tpu.vector_store %arg11[%c0_5, %c0_6], %5 {strides = array<i32>} : memref<64x512xf32, #tpu.memory_space<vmem>>, vector<64x512xf32>,
    %c0_7 = arith.constant 0 : index
    %c0_8 = arith.constant 0 : index
    %7 = vector.load %arg5[%c0_7, %c0_8] : memref<128x512xf32, #tpu.memory_space<vmem>>, vector<128x512xf32>
    %c0_9 = arith.constant 0 : index
    %c0_10 = arith.constant 0 : index
    %8 = vector.load %arg1[%c0_9, %c0_10] : memref<8x128xf32, #tpu.memory_space<vmem>>, vector<8x128xf32>
    %c0_11 = arith.constant 0 : index
    %c0_12 = arith.constant 0 : index
    %9 = vector.load %arg2[%c0_11, %c0_12] : memref<8x128xf32, #tpu.memory_space<vmem>>, vector<8x128xf32>
    %c0_i32 = arith.constant 0 : i32
    %c8_i32 = arith.constant 8 : i32
    %10 = arith.muli %c0_i32, %c8_i32 : i32
    %11 = tpu.assume_multiple %10, 8 : i32
    %12 = arith.index_cast %11 : i32 to index
    %c0_13 = arith.constant 0 : index
    %13 = vector.load %arg11[%12, %c0_13] : memref<64x512xf32, #tpu.memory_space<vmem>>, vector<8x512xf32>
    %cst_14 = arith.constant dense<0.000000e+00> : vector<8x512xf32>
    %14 = tpu.matmul %8, %7, %cst_14 {dimension_numbers = #tpu.dot_dimension_numbers<[1], [0], [0], [1], [0, 0, 1, 1], [], []>} : vector<8x128xf32>, vector<128x512xf32>, vector<8x512xf32> -> vector<8x512xf32>
    %15 = arith.addf %13, %14 : vector<8x512xf32>
    %16 = vector.extract_strided_slice %15 {offsets = [0, 0], sizes = [8, 384], strides = [1, 1]} : vector<8x512xf32> to vector<8x384xf32>
    %17 = arith.negf %16 : vector<8x384xf32>
    %18 = math.exp %17 : vector<8x384xf32>
    %cst_15 = arith.constant 1.000000e+00 : f32
    %19 = vector.broadcast %cst_15 : f32 to vector<8x384xf32>
    %20 = arith.addf %19, %18 : vector<8x384xf32>
    %21 = arith.divf %19, %20 : vector<8x384xf32>
    %22 = vector.extract_strided_slice %21 {offsets = [0, 0], sizes = [8, 128], strides = [1, 1]} : vector<8x384xf32> to vector<8x128xf32>
    %23 = vector.extract_strided_slice %21 {offsets = [0, 128], sizes = [8, 128], strides = [1, 1]} : vector<8x384xf32> to vector<8x128xf32>
    %24 = vector.extract_strided_slice %21 {offsets = [0, 256], sizes = [8, 128], strides = [1, 1]} : vector<8x384xf32> to vector<8x128xf32>
    %25 = vector.extract_strided_slice %15 {offsets = [0, 384], sizes = [8, 128], strides = [1, 1]} : vector<8x512xf32> to vector<8x128xf32>
    %26 = math.tanh %25 : vector<8x128xf32>
    %27 = arith.mulf %23, %9 : vector<8x128xf32>
    %28 = arith.mulf %22, %26 : vector<8x128xf32>
    %29 = arith.addf %27, %28 : vector<8x128xf32>
    %30 = math.tanh %29 : vector<8x128xf32>
    %31 = arith.mulf %24, %30 : vector<8x128xf32>
    %32 = arith.index_cast %11 : i32 to index
    %c0_16 = arith.constant 0 : index
    %33 = vector.load %arg12[%32, %c0_16] : memref<64x128xf32, #tpu.memory_space<vmem>>, vector<8x128xf32>
    tpu.vector_store %arg12[%32, %c0_16], %31 {strides = array<i32>} : memref<64x128xf32, #tpu.memory_space<vmem>>, vector<8x128xf32>,
    %c1_i32 = arith.constant 1 : i32
    %c8_i32_17 = arith.constant 8 : i32
    %34 = arith.muli %c1_i32, %c8_i32_17 : i32
    %35 = tpu.assume_multiple %34, 8 : i32
    %36 = arith.index_cast %35 : i32 to index
    %c0_18 = arith.constant 0 : index
    %37 = vector.load %arg11[%36, %c0_18] : memref<64x512xf32, #tpu.memory_space<vmem>>, vector<8x512xf32>
    %cst_19 = arith.constant dense<0.000000e+00> : vector<8x512xf32>
    %38 = tpu.matmul %31, %7, %cst_19 {dimension_numbers = #tpu.dot_dimension_numbers<[1], [0], [0], [1], [0, 0, 1, 1], [], []>} : vector<8x128xf32>, vector<128x512xf32>, vector<8x512xf32> -> vector<8x512xf32>
    %39 = arith.addf %37, %38 : vector<8x512xf32>
    %40 = vector.extract_strided_slice %39 {offsets = [0, 0], sizes = [8, 384], strides = [1, 1]} : vector<8x512xf32> to vector<8x384xf32>
    %41 = arith.negf %40 : vector<8x384xf32>
    %42 = math.exp %41 : vector<8x384xf32>
    %cst_20 = arith.constant 1.000000e+00 : f32
    %43 = vector.broadcast %cst_20 : f32 to vector<8x384xf32>
    %44 = arith.addf %43, %42 : vector<8x384xf32>
    %45 = arith.divf %43, %44 : vector<8x384xf32>
    %46 = vector.extract_strided_slice %45 {offsets = [0, 0], sizes = [8, 128], strides = [1, 1]} : vector<8x384xf32> to vector<8x128xf32>
    %47 = vector.extract_strided_slice %45 {offsets = [0, 128], sizes = [8, 128], strides = [1, 1]} : vector<8x384xf32> to vector<8x128xf32>
    %48 = vector.extract_strided_slice %45 {offsets = [0, 256], sizes = [8, 128], strides = [1, 1]} : vector<8x384xf32> to vector<8x128xf32>
    %49 = vector.extract_strided_slice %39 {offsets = [0, 384], sizes = [8, 128], strides = [1, 1]} : vector<8x512xf32> to vector<8x128xf32>
    %50 = math.tanh %49 : vector<8x128xf32>
    %51 = arith.mulf %47, %29 : vector<8x128xf32>
    %52 = arith.mulf %46, %50 : vector<8x128xf32>
    %53 = arith.addf %51, %52 : vector<8x128xf32>
    %54 = math.tanh %53 : vector<8x128xf32>
    %55 = arith.mulf %48, %54 : vector<8x128xf32>
    %56 = arith.index_cast %35 : i32 to index
    %c0_21 = arith.constant 0 : index
    %57 = vector.load %arg12[%56, %c0_21] : memref<64x128xf32, #tpu.memory_space<vmem>>, vector<8x128xf32>
    tpu.vector_store %arg12[%56, %c0_21], %55 {strides = array<i32>} : memref<64x128xf32, #tpu.memory_space<vmem>>, vector<8x128xf32>,
    %c2_i32 = arith.constant 2 : i32
    %c8_i32_22 = arith.constant 8 : i32
    %58 = arith.muli %c2_i32, %c8_i32_22 : i32
    %59 = tpu.assume_multiple %58, 8 : i32
    %60 = arith.index_cast %59 : i32 to index
    %c0_23 = arith.constant 0 : index
    %61 = vector.load %arg11[%60, %c0_23] : memref<64x512xf32, #tpu.memory_space<vmem>>, vector<8x512xf32>
    %cst_24 = arith.constant dense<0.000000e+00> : vector<8x512xf32>
    %62 = tpu.matmul %55, %7, %cst_24 {dimension_numbers = #tpu.dot_dimension_numbers<[1], [0], [0], [1], [0, 0, 1, 1], [], []>} : vector<8x128xf32>, vector<128x512xf32>, vector<8x512xf32> -> vector<8x512xf32>
    %63 = arith.addf %61, %62 : vector<8x512xf32>
    %64 = vector.extract_strided_slice %63 {offsets = [0, 0], sizes = [8, 384], strides = [1, 1]} : vector<8x512xf32> to vector<8x384xf32>
    %65 = arith.negf %64 : vector<8x384xf32>
    %66 = math.exp %65 : vector<8x384xf32>
    %cst_25 = arith.constant 1.000000e+00 : f32
    %67 = vector.broadcast %cst_25 : f32 to vector<8x384xf32>
    %68 = arith.addf %67, %66 : vector<8x384xf32>
    %69 = arith.divf %67, %68 : vector<8x384xf32>
    %70 = vector.extract_strided_slice %69 {offsets = [0, 0], sizes = [8, 128], strides = [1, 1]} : vector<8x384xf32> to vector<8x128xf32>
    %71 = vector.extract_strided_slice %69 {offsets = [0, 128], sizes = [8, 128], strides = [1, 1]} : vector<8x384xf32> to vector<8x128xf32>
    %72 = vector.extract_strided_slice %69 {offsets = [0, 256], sizes = [8, 128], strides = [1, 1]} : vector<8x384xf32> to vector<8x128xf32>
    %73 = vector.extract_strided_slice %63 {offsets = [0, 384], sizes = [8, 128], strides = [1, 1]} : vector<8x512xf32> to vector<8x128xf32>
    %74 = math.tanh %73 : vector<8x128xf32>
    %75 = arith.mulf %71, %53 : vector<8x128xf32>
    %76 = arith.mulf %70, %74 : vector<8x128xf32>
    %77 = arith.addf %75, %76 : vector<8x128xf32>
    %78 = math.tanh %77 : vector<8x128xf32>
    %79 = arith.mulf %72, %78 : vector<8x128xf32>
    %80 = arith.index_cast %59 : i32 to index
    %c0_26 = arith.constant 0 : index
    %81 = vector.load %arg12[%80, %c0_26] : memref<64x128xf32, #tpu.memory_space<vmem>>, vector<8x128xf32>
    tpu.vector_store %arg12[%80, %c0_26], %79 {strides = array<i32>} : memref<64x128xf32, #tpu.memory_space<vmem>>, vector<8x128xf32>,
    %c3_i32 = arith.constant 3 : i32
    %c8_i32_27 = arith.constant 8 : i32
    %82 = arith.muli %c3_i32, %c8_i32_27 : i32
    %83 = tpu.assume_multiple %82, 8 : i32
    %84 = arith.index_cast %83 : i32 to index
    %c0_28 = arith.constant 0 : index
    %85 = vector.load %arg11[%84, %c0_28] : memref<64x512xf32, #tpu.memory_space<vmem>>, vector<8x512xf32>
    %cst_29 = arith.constant dense<0.000000e+00> : vector<8x512xf32>
    %86 = tpu.matmul %79, %7, %cst_29 {dimension_numbers = #tpu.dot_dimension_numbers<[1], [0], [0], [1], [0, 0, 1, 1], [], []>} : vector<8x128xf32>, vector<128x512xf32>, vector<8x512xf32> -> vector<8x512xf32>
    %87 = arith.addf %85, %86 : vector<8x512xf32>
    %88 = vector.extract_strided_slice %87 {offsets = [0, 0], sizes = [8, 384], strides = [1, 1]} : vector<8x512xf32> to vector<8x384xf32>
    %89 = arith.negf %88 : vector<8x384xf32>
    %90 = math.exp %89 : vector<8x384xf32>
    %cst_30 = arith.constant 1.000000e+00 : f32
    %91 = vector.broadcast %cst_30 : f32 to vector<8x384xf32>
    %92 = arith.addf %91, %90 : vector<8x384xf32>
    %93 = arith.divf %91, %92 : vector<8x384xf32>
    %94 = vector.extract_strided_slice %93 {offsets = [0, 0], sizes = [8, 128], strides = [1, 1]} : vector<8x384xf32> to vector<8x128xf32>
    %95 = vector.extract_strided_slice %93 {offsets = [0, 128], sizes = [8, 128], strides = [1, 1]} : vector<8x384xf32> to vector<8x128xf32>
    %96 = vector.extract_strided_slice %93 {offsets = [0, 256], sizes = [8, 128], strides = [1, 1]} : vector<8x384xf32> to vector<8x128xf32>
    %97 = vector.extract_strided_slice %87 {offsets = [0, 384], sizes = [8, 128], strides = [1, 1]} : vector<8x512xf32> to vector<8x128xf32>
    %98 = math.tanh %97 : vector<8x128xf32>
    %99 = arith.mulf %95, %77 : vector<8x128xf32>
    %100 = arith.mulf %94, %98 : vector<8x128xf32>
    %101 = arith.addf %99, %100 : vector<8x128xf32>
    %102 = math.tanh %101 : vector<8x128xf32>
    %103 = arith.mulf %96, %102 : vector<8x128xf32>
    %104 = arith.index_cast %83 : i32 to index
    %c0_31 = arith.constant 0 : index
    %105 = vector.load %arg12[%104, %c0_31] : memref<64x128xf32, #tpu.memory_space<vmem>>, vector<8x128xf32>
    tpu.vector_store %arg12[%104, %c0_31], %103 {strides = array<i32>} : memref<64x128xf32, #tpu.memory_space<vmem>>, vector<8x128xf32>,
    %c4_i32 = arith.constant 4 : i32
    %c8_i32_32 = arith.constant 8 : i32
    %106 = arith.muli %c4_i32, %c8_i32_32 : i32
    %107 = tpu.assume_multiple %106, 8 : i32
    %108 = arith.index_cast %107 : i32 to index
    %c0_33 = arith.constant 0 : index
    %109 = vector.load %arg11[%108, %c0_33] : memref<64x512xf32, #tpu.memory_space<vmem>>, vector<8x512xf32>
    %cst_34 = arith.constant dense<0.000000e+00> : vector<8x512xf32>
    %110 = tpu.matmul %103, %7, %cst_34 {dimension_numbers = #tpu.dot_dimension_numbers<[1], [0], [0], [1], [0, 0, 1, 1], [], []>} : vector<8x128xf32>, vector<128x512xf32>, vector<8x512xf32> -> vector<8x512xf32>
    %111 = arith.addf %109, %110 : vector<8x512xf32>
    %112 = vector.extract_strided_slice %111 {offsets = [0, 0], sizes = [8, 384], strides = [1, 1]} : vector<8x512xf32> to vector<8x384xf32>
    %113 = arith.negf %112 : vector<8x384xf32>
    %114 = math.exp %113 : vector<8x384xf32>
    %cst_35 = arith.constant 1.000000e+00 : f32
    %115 = vector.broadcast %cst_35 : f32 to vector<8x384xf32>
    %116 = arith.addf %115, %114 : vector<8x384xf32>
    %117 = arith.divf %115, %116 : vector<8x384xf32>
    %118 = vector.extract_strided_slice %117 {offsets = [0, 0], sizes = [8, 128], strides = [1, 1]} : vector<8x384xf32> to vector<8x128xf32>
    %119 = vector.extract_strided_slice %117 {offsets = [0, 128], sizes = [8, 128], strides = [1, 1]} : vector<8x384xf32> to vector<8x128xf32>
    %120 = vector.extract_strided_slice %117 {offsets = [0, 256], sizes = [8, 128], strides = [1, 1]} : vector<8x384xf32> to vector<8x128xf32>
    %121 = vector.extract_strided_slice %111 {offsets = [0, 384], sizes = [8, 128], strides = [1, 1]} : vector<8x512xf32> to vector<8x128xf32>
    %122 = math.tanh %121 : vector<8x128xf32>
    %123 = arith.mulf %119, %101 : vector<8x128xf32>
    %124 = arith.mulf %118, %122 : vector<8x128xf32>
    %125 = arith.addf %123, %124 : vector<8x128xf32>
    %126 = math.tanh %125 : vector<8x128xf32>
    %127 = arith.mulf %120, %126 : vector<8x128xf32>
    %128 = arith.index_cast %107 : i32 to index
    %c0_36 = arith.constant 0 : index
    %129 = vector.load %arg12[%128, %c0_36] : memref<64x128xf32, #tpu.memory_space<vmem>>, vector<8x128xf32>
    tpu.vector_store %arg12[%128, %c0_36], %127 {strides = array<i32>} : memref<64x128xf32, #tpu.memory_space<vmem>>, vector<8x128xf32>,
    %c5_i32 = arith.constant 5 : i32
    %c8_i32_37 = arith.constant 8 : i32
    %130 = arith.muli %c5_i32, %c8_i32_37 : i32
    %131 = tpu.assume_multiple %130, 8 : i32
    %132 = arith.index_cast %131 : i32 to index
    %c0_38 = arith.constant 0 : index
    %133 = vector.load %arg11[%132, %c0_38] : memref<64x512xf32, #tpu.memory_space<vmem>>, vector<8x512xf32>
    %cst_39 = arith.constant dense<0.000000e+00> : vector<8x512xf32>
    %134 = tpu.matmul %127, %7, %cst_39 {dimension_numbers = #tpu.dot_dimension_numbers<[1], [0], [0], [1], [0, 0, 1, 1], [], []>} : vector<8x128xf32>, vector<128x512xf32>, vector<8x512xf32> -> vector<8x512xf32>
    %135 = arith.addf %133, %134 : vector<8x512xf32>
    %136 = vector.extract_strided_slice %135 {offsets = [0, 0], sizes = [8, 384], strides = [1, 1]} : vector<8x512xf32> to vector<8x384xf32>
    %137 = arith.negf %136 : vector<8x384xf32>
    %138 = math.exp %137 : vector<8x384xf32>
    %cst_40 = arith.constant 1.000000e+00 : f32
    %139 = vector.broadcast %cst_40 : f32 to vector<8x384xf32>
    %140 = arith.addf %139, %138 : vector<8x384xf32>
    %141 = arith.divf %139, %140 : vector<8x384xf32>
    %142 = vector.extract_strided_slice %141 {offsets = [0, 0], sizes = [8, 128], strides = [1, 1]} : vector<8x384xf32> to vector<8x128xf32>
    %143 = vector.extract_strided_slice %141 {offsets = [0, 128], sizes = [8, 128], strides = [1, 1]} : vector<8x384xf32> to vector<8x128xf32>
    %144 = vector.extract_strided_slice %141 {offsets = [0, 256], sizes = [8, 128], strides = [1, 1]} : vector<8x384xf32> to vector<8x128xf32>
    %145 = vector.extract_strided_slice %135 {offsets = [0, 384], sizes = [8, 128], strides = [1, 1]} : vector<8x512xf32> to vector<8x128xf32>
    %146 = math.tanh %145 : vector<8x128xf32>
    %147 = arith.mulf %143, %125 : vector<8x128xf32>
    %148 = arith.mulf %142, %146 : vector<8x128xf32>
    %149 = arith.addf %147, %148 : vector<8x128xf32>
    %150 = math.tanh %149 : vector<8x128xf32>
    %151 = arith.mulf %144, %150 : vector<8x128xf32>
    %152 = arith.index_cast %131 : i32 to index
    %c0_41 = arith.constant 0 : index
    %153 = vector.load %arg12[%152, %c0_41] : memref<64x128xf32, #tpu.memory_space<vmem>>, vector<8x128xf32>
    tpu.vector_store %arg12[%152, %c0_41], %151 {strides = array<i32>} : memref<64x128xf32, #tpu.memory_space<vmem>>, vector<8x128xf32>,
    %c6_i32 = arith.constant 6 : i32
    %c8_i32_42 = arith.constant 8 : i32
    %154 = arith.muli %c6_i32, %c8_i32_42 : i32
    %155 = tpu.assume_multiple %154, 8 : i32
    %156 = arith.index_cast %155 : i32 to index
    %c0_43 = arith.constant 0 : index
    %157 = vector.load %arg11[%156, %c0_43] : memref<64x512xf32, #tpu.memory_space<vmem>>, vector<8x512xf32>
    %cst_44 = arith.constant dense<0.000000e+00> : vector<8x512xf32>
    %158 = tpu.matmul %151, %7, %cst_44 {dimension_numbers = #tpu.dot_dimension_numbers<[1], [0], [0], [1], [0, 0, 1, 1], [], []>} : vector<8x128xf32>, vector<128x512xf32>, vector<8x512xf32> -> vector<8x512xf32>
    %159 = arith.addf %157, %158 : vector<8x512xf32>
    %160 = vector.extract_strided_slice %159 {offsets = [0, 0], sizes = [8, 384], strides = [1, 1]} : vector<8x512xf32> to vector<8x384xf32>
    %161 = arith.negf %160 : vector<8x384xf32>
    %162 = math.exp %161 : vector<8x384xf32>
    %cst_45 = arith.constant 1.000000e+00 : f32
    %163 = vector.broadcast %cst_45 : f32 to vector<8x384xf32>
    %164 = arith.addf %163, %162 : vector<8x384xf32>
    %165 = arith.divf %163, %164 : vector<8x384xf32>
    %166 = vector.extract_strided_slice %165 {offsets = [0, 0], sizes = [8, 128], strides = [1, 1]} : vector<8x384xf32> to vector<8x128xf32>
    %167 = vector.extract_strided_slice %165 {offsets = [0, 128], sizes = [8, 128], strides = [1, 1]} : vector<8x384xf32> to vector<8x128xf32>
    %168 = vector.extract_strided_slice %165 {offsets = [0, 256], sizes = [8, 128], strides = [1, 1]} : vector<8x384xf32> to vector<8x128xf32>
    %169 = vector.extract_strided_slice %159 {offsets = [0, 384], sizes = [8, 128], strides = [1, 1]} : vector<8x512xf32> to vector<8x128xf32>
    %170 = math.tanh %169 : vector<8x128xf32>
    %171 = arith.mulf %167, %149 : vector<8x128xf32>
    %172 = arith.mulf %166, %170 : vector<8x128xf32>
    %173 = arith.addf %171, %172 : vector<8x128xf32>
    %174 = math.tanh %173 : vector<8x128xf32>
    %175 = arith.mulf %168, %174 : vector<8x128xf32>
    %176 = arith.index_cast %155 : i32 to index
    %c0_46 = arith.constant 0 : index
    %177 = vector.load %arg12[%176, %c0_46] : memref<64x128xf32, #tpu.memory_space<vmem>>, vector<8x128xf32>
    tpu.vector_store %arg12[%176, %c0_46], %175 {strides = array<i32>} : memref<64x128xf32, #tpu.memory_space<vmem>>, vector<8x128xf32>,
    %c7_i32 = arith.constant 7 : i32
    %c8_i32_47 = arith.constant 8 : i32
    %178 = arith.muli %c7_i32, %c8_i32_47 : i32
    %179 = tpu.assume_multiple %178, 8 : i32
    %180 = arith.index_cast %179 : i32 to index
    %c0_48 = arith.constant 0 : index
    %181 = vector.load %arg11[%180, %c0_48] : memref<64x512xf32, #tpu.memory_space<vmem>>, vector<8x512xf32>
    %cst_49 = arith.constant dense<0.000000e+00> : vector<8x512xf32>
    %182 = tpu.matmul %175, %7, %cst_49 {dimension_numbers = #tpu.dot_dimension_numbers<[1], [0], [0], [1], [0, 0, 1, 1], [], []>} : vector<8x128xf32>, vector<128x512xf32>, vector<8x512xf32> -> vector<8x512xf32>
    %183 = arith.addf %181, %182 : vector<8x512xf32>
    %184 = vector.extract_strided_slice %183 {offsets = [0, 0], sizes = [8, 384], strides = [1, 1]} : vector<8x512xf32> to vector<8x384xf32>
    %185 = arith.negf %184 : vector<8x384xf32>
    %186 = math.exp %185 : vector<8x384xf32>
    %cst_50 = arith.constant 1.000000e+00 : f32
    %187 = vector.broadcast %cst_50 : f32 to vector<8x384xf32>
    %188 = arith.addf %187, %186 : vector<8x384xf32>
    %189 = arith.divf %187, %188 : vector<8x384xf32>
    %190 = vector.extract_strided_slice %189 {offsets = [0, 0], sizes = [8, 128], strides = [1, 1]} : vector<8x384xf32> to vector<8x128xf32>
    %191 = vector.extract_strided_slice %189 {offsets = [0, 128], sizes = [8, 128], strides = [1, 1]} : vector<8x384xf32> to vector<8x128xf32>
    %192 = vector.extract_strided_slice %189 {offsets = [0, 256], sizes = [8, 128], strides = [1, 1]} : vector<8x384xf32> to vector<8x128xf32>
    %193 = vector.extract_strided_slice %183 {offsets = [0, 384], sizes = [8, 128], strides = [1, 1]} : vector<8x512xf32> to vector<8x128xf32>
    %194 = math.tanh %193 : vector<8x128xf32>
    %195 = arith.mulf %191, %173 : vector<8x128xf32>
    %196 = arith.mulf %190, %194 : vector<8x128xf32>
    %197 = arith.addf %195, %196 : vector<8x128xf32>
    %198 = math.tanh %197 : vector<8x128xf32>
    %199 = arith.mulf %192, %198 : vector<8x128xf32>
    %200 = arith.index_cast %179 : i32 to index
    %c0_51 = arith.constant 0 : index
    %201 = vector.load %arg12[%200, %c0_51] : memref<64x128xf32, #tpu.memory_space<vmem>>, vector<8x128xf32>
    tpu.vector_store %arg12[%200, %c0_51], %199 {strides = array<i32>} : memref<64x128xf32, #tpu.memory_space<vmem>>, vector<8x128xf32>,
    %c8_i32_52 = arith.constant 8 : i32
    %c0_53 = arith.constant 0 : index
    %c0_54 = arith.constant 0 : index
    %202 = vector.load %arg9[%c0_53, %c0_54] : memref<8x128xf32, #tpu.memory_space<vmem>>, vector<8x128xf32>
    tpu.vector_store %arg9[%c0_53, %c0_54], %199 {strides = array<i32>} : memref<8x128xf32, #tpu.memory_space<vmem>>, vector<8x128xf32>,
    %c0_55 = arith.constant 0 : index
    %c0_56 = arith.constant 0 : index
    %203 = vector.load %arg10[%c0_55, %c0_56] : memref<8x128xf32, #tpu.memory_space<vmem>>, vector<8x128xf32>
    tpu.vector_store %arg10[%c0_55, %c0_56], %197 {strides = array<i32>} : memref<8x128xf32, #tpu.memory_space<vmem>>, vector<8x128xf32>,
    %c0_57 = arith.constant 0 : index
    %c0_58 = arith.constant 0 : index
    %204 = vector.load %arg12[%c0_57, %c0_58] : memref<64x128xf32, #tpu.memory_space<vmem>>, vector<64x128xf32>
    %c0_59 = arith.constant 0 : index
    %c0_60 = arith.constant 0 : index
    %205 = vector.load %arg6[%c0_59, %c0_60] : memref<128x256xf32, #tpu.memory_space<vmem>>, vector<128x256xf32>
    %cst_61 = arith.constant dense<0.000000e+00> : vector<64x256xf32>
    %206 = tpu.matmul %204, %205, %cst_61 {dimension_numbers = #tpu.dot_dimension_numbers<[1], [0], [0], [1], [0, 0, 1, 1], [], []>} : vector<64x128xf32>, vector<128x256xf32>, vector<64x256xf32> -> vector<64x256xf32>
    %c0_62 = arith.constant 0 : index
    %c0_63 = arith.constant 0 : index
    %207 = vector.load %arg7[%c0_62, %c0_63] : memref<1x256xf32, #tpu.memory_space<vmem>>, vector<1x256xf32>
    %208 = vector.broadcast %207 : vector<1x256xf32> to vector<64x256xf32>
    %209 = arith.addf %206, %208 : vector<64x256xf32>
    %c0_64 = arith.constant 0 : index
    %c0_65 = arith.constant 0 : index
    %210 = vector.load %arg8[%c0_64, %c0_65] : memref<64x256xf32, #tpu.memory_space<vmem>>, vector<64x256xf32>
    tpu.vector_store %arg8[%c0_64, %c0_65], %209 {strides = array<i32>} : memref<64x256xf32, #tpu.memory_space<vmem>>, vector<64x256xf32>,
    return
  }
}

</mosaic_0001>

<bundles_post_ra>
// kernel: tpu_custom_call.1
= control target key start
LH: loop header
LB: loop body
LE: loop exit
PB: predicated region body
PF: predicated region fallthrough
CT: control target
= control target key end

     0   :  { %16 = vsyncpa [#allocation5], 0  ;;  %s3896_s0 = inlined_call_operand.hbm [shape: f32[64,256], index: 0, kind: input, shape index: {}]   ;;  %s3897_s1 = inlined_call_operand.hbm [shape: f32[8,128], index: 1, kind: input, shape index: {}]   ;;  %s3898_s2 = inlined_call_operand.hbm [shape: f32[8,128], index: 2, kind: input, shape index: {}]   ;;  %s3899_s3 = inlined_call_operand.hbm [shape: f32[256,512], index: 3, kind: input, shape index: {}]   ;;  %s3900_s4 = inlined_call_operand.vmem [shape: f32[1,512], index: 4, kind: input, shape index: {}]   ;;  %s3901_s5 = inlined_call_operand.hbm [shape: f32[128,512], index: 5, kind: input, shape index: {}]   ;;  %s3902_s6 = inlined_call_operand.hbm [shape: f32[128,256], index: 6, kind: input, shape index: {}]   ;;  %s3903_s7 = inlined_call_operand.vmem [shape: f32[1,256], index: 7, kind: input, shape index: {}]   ;;  %s3904_s8 = inlined_call_operand.hbm [shape: f32[64,256], index: 8, kind: output, shape index: {0}]   ;;  %s3905_s9 = inlined_call_operand.hbm [shape: f32[8,128], index: 9, kind: output, shape index: {1}]   ;;  %s3906_s10 = inlined_call_operand.hbm [shape: f32[8,128], index: 10, kind: output, shape index: {2}]  }
   0x1   :  { %17 = vsyncpa [#allocation8], 0 }
   0x2   :  { %18 = vsyncpa [#allocation11], 0 }
   0x3   :  { %19 = vsyncpa [#allocation14], 0 }
   0x4   :  { %20 = vsyncpa [#allocation6], 0 }
   0x5   :  { %21 = vsyncpa [#allocation17], 0  ;;  %s2692_s13 = smov [#allocation7]   ;;  %s2693_s15 = smov [#allocation10]  }
   0x6   :  { %s40_s14 = sshll.u32 %s2692_s13, 4  ;;  %s59_s16 = sshll.u32 %s2693_s15, 4  ;;  %s41_s14 = int_to_ptr.vmem [resolvable:$true] %s40_s14  ;;  %s60_s16 = int_to_ptr.vmem [resolvable:$true] %s59_s16 }
   0x7   :  { %s2508_s17 = scalar_lea.vmem %s41_s14, 128  ;;  %p2513_p1 = scmp.lt.s32.totalorder %s41_s14, %s41_s14 }
   0x8   :  { %p2509_p0 = scmp.ne.s32.totalorder %s41_s14, %s2508_s17  ;;  %p2514_p2 = scmp.lt.s32.totalorder %s2508_s17, %s2508_s17 }
   0xa   :  { %p2515_p3 = por %p2514_p2, %p2513_p1 }
   0xc   :  { %p2516_p4 = pnand %p2515_p3, %p2509_p0 }
   0xe   :  { %2519 = shalt.err (!%p2516_p4)
}
   0xf   :  { %43 = dma.hbm_to_vmem [thread:$0]  %s3897_s1, 128, %s41_s14, [#allocation8]  }
  0x10   :  { %s2528_s20 = scalar_lea.vmem %s60_s16, 16384  ;;  %p2533_p6 = scmp.lt.s32.totalorder %s60_s16, %s60_s16 }
  0x11   :  { %p2529_p5 = scmp.ne.s32.totalorder %s60_s16, %s2528_s20  ;;  %p2534_p7 = scmp.lt.s32.totalorder %s2528_s20, %s2528_s20 }
  0x13   :  { %p2535_p8 = por %p2534_p7, %p2533_p6 }
  0x15   :  { %p2536_p9 = pnand %p2535_p8, %p2529_p5 }
  0x17   :  { %2539 = shalt.err (!%p2536_p9)
}
  0x18   :  { %s2694_s21 = smov 512   ;;  %s2695_s22 = smov 32  }
  0x19   :  { %65 = dma.hbm_to_vmem [thread:$0]  %s3899_s3, 16384, %s60_s16, [#allocation11], %s2694_s21, %s2694_s21, %s2695_s22  }
  0x1a   :  { %s2696_s25 = smov [#allocation4]  }
  0x1b   :  { %s27_s26 = sshll.u32 %s2696_s25, 4  ;;  %s28_s26 = int_to_ptr.vmem [resolvable:$true] %s27_s26 }
  0x1c   :  { %s2548_s1 = scalar_lea.vmem %s28_s26, 2048  ;;  %p2553_p11 = scmp.lt.s32.totalorder %s28_s26, %s28_s26 }
  0x1d   :  { %p2549_p10 = scmp.ne.s32.totalorder %s28_s26, %s2548_s1  ;;  %p2554_p12 = scmp.lt.s32.totalorder %s2548_s1, %s2548_s1 }
  0x1f   :  { %p2555_p13 = por %p2554_p12, %p2553_p11 }
  0x21   :  { %p2556_p0 = pnand %p2555_p13, %p2549_p10 }
  0x23   :  { %2559 = shalt.err (!%p2556_p0)
}
  0x24   :  { %s2697_s27 = smov 256   ;;  %s2698_s28 = smov 16  }
  0x25   :  { %33 = dma.hbm_to_vmem [thread:$0]  %s3896_s0, 2048, %s28_s26, [#allocation5], %s2697_s27, %s2697_s27, %s2698_s28  }
  0x26   :  { %s2699_s3 = smov [#allocation9]   ;;  %s2700_s12 = smov [#allocation12]  }
  0x27   :  { %s50_s11 = sshll.u32 %s2699_s3, 4  ;;  %s73_s13 = sshll.u32 %s2700_s12, 4  ;;  %s51_s11 = int_to_ptr.vmem [resolvable:$true] %s50_s11  ;;  %s74_s13 = int_to_ptr.vmem [resolvable:$true] %s73_s13 }
  0x28   :  { %s2568_s14 = scalar_lea.vmem %s51_s11, 128  ;;  %p2573_p2 = scmp.lt.s32.totalorder %s51_s11, %s51_s11 }
  0x29   :  { %p2569_p1 = scmp.ne.s32.totalorder %s51_s11, %s2568_s14  ;;  %p2574_p3 = scmp.lt.s32.totalorder %s2568_s14, %s2568_s14 }
  0x2b   :  { %p2575_p4 = por %p2574_p3, %p2573_p2 }
  0x2d   :  { %p2576_p5 = pnand %p2575_p4, %p2569_p1 }
  0x2f   :  { %2579 = shalt.err (!%p2576_p5)
}
  0x30   :  { %53 = dma.hbm_to_vmem [thread:$0]  %s3898_s2, 128, %s51_s11, [#allocation8]  }
  0x31   :  { %s2588_s17 = scalar_lea.vmem %s74_s13, 8192  ;;  %p2593_p7 = scmp.lt.s32.totalorder %s74_s13, %s74_s13 }
  0x32   :  { %p2589_p6 = scmp.ne.s32.totalorder %s74_s13, %s2588_s17  ;;  %p2594_p8 = scmp.lt.s32.totalorder %s2588_s17, %s2588_s17 }
  0x34   :  { %p2595_p9 = por %p2594_p8, %p2593_p7 }
  0x36   :  { %p2596_p10 = pnand %p2595_p9, %p2589_p6 }
  0x38   :  { %2599 = shalt.err (!%p2596_p10)
}
  0x39   :  { %79 = dma.hbm_to_vmem [thread:$0]  %s3901_s5, 8192, %s74_s13, [#allocation11], %s2694_s21, %s2694_s21, %s2695_s22  }
  0x3a   :  { %s2701_s19 = smov [#allocation13]  }
  0x3b   :  { %s85_s20 = sshll.u32 %s2701_s19, 4  ;;  %s86_s20 = int_to_ptr.vmem [resolvable:$true] %s85_s20 }
  0x3c   :  { %s2608_s23 = scalar_lea.vmem %s86_s20, 4096  ;;  %p2613_p12 = scmp.lt.s32.totalorder %s86_s20, %s86_s20 }
  0x3d   :  { %p2609_p11 = scmp.ne.s32.totalorder %s86_s20, %s2608_s23  ;;  %p2614_p13 = scmp.lt.s32.totalorder %s2608_s23, %s2608_s23 }
  0x3f   :  { %p2615_p0 = por %p2614_p13, %p2613_p12 }
  0x41   :  { %p2616_p1 = pnand %p2615_p0, %p2609_p11 }
  0x43   :  { %2619 = shalt.err (!%p2616_p1)
}
  0x44   :  { %91 = dma.hbm_to_vmem [thread:$0]  %s3902_s6, 4096, %s86_s20, [#allocation14], %s2697_s27, %s2697_s27, %s2698_s28  }
  0x45   :  { %2680 = dma.done.wait [#allocation5], 2048  }
  0x46   :  { %2681 = vsyncadd [#allocation5], 4294965248 }
  0x47   :  { %2682 = dma.done.wait [#allocation8], 256  }
  0x48   :  { %2683 = vsyncadd [#allocation8], 4294967040 }
  0x49   :  { %2684 = dma.done.wait [#allocation11], 24576  }
  0x4a   :  { %2685 = vsyncadd [#allocation11], 4294942720 }
  0x4b   :  { %2686 = dma.done.wait [#allocation14], 4096  }
  0x4c   :  { %2687 = vsyncadd [#allocation14], 4294963200  ;;  %v191_v0 = vld [vmem:[#allocation10 + $0x1f8] sm:$0xff]  ;;  %v190_v1 = vld [vmem:[#allocation10 + $0x1f0] sm:$0xff] }
  0x4d   :  { %v187_v2 = vld [vmem:[#allocation10 + $0x1d8] sm:$0xff]  ;;  %391 = vmatprep.subr.mxu1 %v191_v0  ;;  %v186_v3 = vld [vmem:[#allocation10 + $0x1d0] sm:$0xff]  ;;  %v189_v13 = vld [vmem:[#allocation10 + $0x1e8] sm:$0xff] }
  0x4e   :  { %392 = vmatpush1.msra.mxu1 %v190_v1  ;;  %v183_v4 = vld [vmem:[#allocation10 + $0x1b8] sm:$0xff]  ;;  %v182_v5 = vld [vmem:[#allocation10 + $0x1b0] sm:$0xff]  ;;  %v188_v14 = vld [vmem:[#allocation10 + $0x1e0] sm:$0xff]  ;;  %278 = vmatprep.subr.mxu0 %v189_v13 }
  0x4f   :  { %393 = vmatprep.subr.mxu1 %v187_v2  ;;  %v179_v6 = vld [vmem:[#allocation10 + $0x198] sm:$0xff]  ;;  %v178_v7 = vld [vmem:[#allocation10 + $0x190] sm:$0xff]  ;;  %v185_v16 = vld [vmem:[#allocation10 + $0x1c8] sm:$0xff]  ;;  %279 = vmatpush1.msra.mxu0 %v188_v14 }
  0x50   :  { %394 = vmatpush1.msra.mxu1 %v186_v3  ;;  %v175_v8 = vld [vmem:[#allocation10 + $0x178] sm:$0xff]  ;;  %v174_v9 = vld [vmem:[#allocation10 + $0x170] sm:$0xff]  ;;  %v184_v18 = vld [vmem:[#allocation10 + $0x1c0] sm:$0xff]  ;;  %280 = vmatprep.subr.mxu0 %v185_v16 }
  0x51   :  { %395 = vmatprep.subr.mxu1 %v183_v4  ;;  %v171_v10 = vld [vmem:[#allocation10 + $0x158] sm:$0xff]  ;;  %v170_v11 = vld [vmem:[#allocation10 + $0x150] sm:$0xff]  ;;  %v181_v19 = vld [vmem:[#allocation10 + $0x1a8] sm:$0xff]  ;;  %281 = vmatpush1.msra.mxu0 %v184_v18 }
  0x52   :  { %396 = vmatpush1.msra.mxu1 %v182_v5  ;;  %v167_v12 = vld [vmem:[#allocation10 + $0x138] sm:$0xff]  ;;  %v166_v15 = vld [vmem:[#allocation10 + $0x130] sm:$0xff]  ;;  %v180_v21 = vld [vmem:[#allocation10 + $0x1a0] sm:$0xff]  ;;  %282 = vmatprep.subr.mxu0 %v181_v19 }
  0x53   :  { %397 = vmatprep.subr.mxu1 %v179_v6  ;;  %v163_v17 = vld [vmem:[#allocation10 + $0x118] sm:$0xff]  ;;  %v162_v20 = vld [vmem:[#allocation10 + $0x110] sm:$0xff]  ;;  %v177_v23 = vld [vmem:[#allocation10 + $0x188] sm:$0xff]  ;;  %283 = vmatpush1.msra.mxu0 %v180_v21 }
  0x54   :  { %398 = vmatpush1.msra.mxu1 %v178_v7  ;;  %v159_v22 = vld [vmem:[#allocation10 + $0xf8] sm:$0xff]  ;;  %v158_v24 = vld [vmem:[#allocation10 + $0xf0] sm:$0xff]  ;;  %v176_v25 = vld [vmem:[#allocation10 + $0x180] sm:$0xff]  ;;  %284 = vmatprep.subr.mxu0 %v177_v23 }
  0x55   :  { %399 = vmatprep.subr.mxu1 %v175_v8  ;;  %v155_v26 = vld [vmem:[#allocation10 + $0xd8] sm:$0xff]  ;;  %v173_v27 = vld [vmem:[#allocation10 + $0x168] sm:$0xff]  ;;  %v154_v28 = vld [vmem:[#allocation10 + $0xd0] sm:$0xff]  ;;  %285 = vmatpush1.msra.mxu0 %v176_v25 }
  0x56   :  { %400 = vmatpush1.msra.mxu1 %v174_v9  ;;  %v172_v29 = vld [vmem:[#allocation10 + $0x160] sm:$0xff]  ;;  %v151_v30 = vld [vmem:[#allocation10 + $0xb8] sm:$0xff]  ;;  %v169_v31 = vld [vmem:[#allocation10 + $0x148] sm:$0xff]  ;;  %286 = vmatprep.subr.mxu0 %v173_v27 }
  0x57   :  { %401 = vmatprep.subr.mxu1 %v171_v10  ;;  %v150_v32 = vld [vmem:[#allocation10 + $0xb0] sm:$0xff]  ;;  %v168_v33 = vld [vmem:[#allocation10 + $0x140] sm:$0xff]  ;;  %v147_v34 = vld [vmem:[#allocation10 + $0x98] sm:$0xff]  ;;  %287 = vmatpush1.msra.mxu0 %v172_v29 }
  0x58   :  { %402 = vmatpush1.msra.mxu1 %v170_v11  ;;  %v165_v35 = vld [vmem:[#allocation10 + $0x128] sm:$0xff]  ;;  %v146_v36 = vld [vmem:[#allocation10 + $0x90] sm:$0xff]  ;;  %288 = vmatprep.subr.mxu0 %v169_v31  ;;  %v164_v37 = vld [vmem:[#allocation10 + $0x120] sm:$0xff] }
  0x59   :  { %403 = vmatprep.subr.mxu1 %v167_v12  ;;  %v143_v38 = vld [vmem:[#allocation10 + $0x78] sm:$0xff]  ;;  %289 = vmatpush1.msra.mxu0 %v168_v33  ;;  %v161_v39 = vld [vmem:[#allocation10 + $0x108] sm:$0xff]  ;;  %v142_v40 = vld [vmem:[#allocation10 + $0x70] sm:$0xff] }
  0x5a   :  { %404 = vmatpush1.msra.mxu1 %v166_v15  ;;  %290 = vmatprep.subr.mxu0 %v165_v35  ;;  %v160_v41 = vld [vmem:[#allocation10 + $0x100] sm:$0xff]  ;;  %v139_v42 = vld [vmem:[#allocation10 + $0x58] sm:$0xff]  ;;  %v157_v43 = vld [vmem:[#allocation10 + $0xe8] sm:$0xff] }
  0x5b   :  { %405 = vmatprep.subr.mxu1 %v163_v17  ;;  %291 = vmatpush1.msra.mxu0 %v164_v37  ;;  %v138_v44 = vld [vmem:[#allocation10 + $0x50] sm:$0xff]  ;;  %v156_v45 = vld [vmem:[#allocation10 + $0xe0] sm:$0xff]  ;;  %v135_v46 = vld [vmem:[#allocation10 + $0x38] sm:$0xff] }
  0x5c   :  { %406 = vmatpush1.msra.mxu1 %v162_v20  ;;  %292 = vmatprep.subr.mxu0 %v161_v39  ;;  %v153_v47 = vld [vmem:[#allocation10 + $0xc8] sm:$0xff]  ;;  %v134_v48 = vld [vmem:[#allocation10 + $0x30] sm:$0xff]  ;;  %v152_v49 = vld [vmem:[#allocation10 + $0xc0] sm:$0xff] }
  0x5d   :  { %407 = vmatprep.subr.mxu1 %v159_v22  ;;  %293 = vmatpush1.msra.mxu0 %v160_v41  ;;  %v131_v50 = vld [vmem:[#allocation10 + $0x18] sm:$0xff]  ;;  %v149_v51 = vld [vmem:[#allocation10 + $0xa8] sm:$0xff]  ;;  %v130_v52 = vld [vmem:[#allocation10 + $0x10] sm:$0xff] }
  0x5e   :  { %408 = vmatpush1.msra.mxu1 %v158_v24  ;;  %294 = vmatprep.subr.mxu0 %v157_v43  ;;  %v148_v53 = vld [vmem:[#allocation10 + $0xa0] sm:$0xff]  ;;  %v255_v54 = vld [vmem:[#allocation10 + $0x3f8] sm:$0xff]  ;;  %v145_v55 = vld [vmem:[#allocation10 + $0x88] sm:$0xff] }
  0x5f   :  { %409 = vmatprep.subr.mxu1 %v155_v26  ;;  %295 = vmatpush1.msra.mxu0 %v156_v45  ;;  %v254_v56 = vld [vmem:[#allocation10 + $0x3f0] sm:$0xff]  ;;  %v144_v57 = vld [vmem:[#allocation10 + $0x80] sm:$0xff]  ;;  %v251_v58 = vld [vmem:[#allocation10 + $0x3d8] sm:$0xff] }
  0x60   :  { %410 = vmatpush1.msra.mxu1 %v154_v28  ;;  %296 = vmatprep.subr.mxu0 %v153_v47  ;;  %v141_v59 = vld [vmem:[#allocation10 + $0x68] sm:$0xff]  ;;  %v250_v60 = vld [vmem:[#allocation10 + $0x3d0] sm:$0xff]  ;;  %v140_v61 = vld [vmem:[#allocation10 + $0x60] sm:$0xff] }
  0x61   :  { %411 = vmatprep.subr.mxu1 %v151_v30  ;;  %297 = vmatpush1.msra.mxu0 %v152_v49  ;;  %v247_v62 = vld [vmem:[#allocation10 + $0x3b8] sm:$0xff]  ;;  %v137_v63 = vld [vmem:[#allocation10 + $0x48] sm:$0xff]  ;;  %v246_v0 = vld [vmem:[#allocation10 + $0x3b0] sm:$0xff] }
  0x62   :  { %412 = vmatpush1.msra.mxu1 %v150_v32  ;;  %298 = vmatprep.subr.mxu0 %v149_v51  ;;  %v136_v1 = vld [vmem:[#allocation10 + $0x40] sm:$0xff]  ;;  %v243_v2 = vld [vmem:[#allocation10 + $0x398] sm:$0xff]  ;;  %v133_v3 = vld [vmem:[#allocation10 + $0x28] sm:$0xff] }
  0x63   :  { %413 = vmatprep.subr.mxu1 %v147_v34  ;;  %299 = vmatpush1.msra.mxu0 %v148_v53  ;;  %v242_v4 = vld [vmem:[#allocation10 + $0x390] sm:$0xff]  ;;  %v132_v5 = vld [vmem:[#allocation10 + $0x20] sm:$0xff]  ;;  %v239_v6 = vld [vmem:[#allocation10 + $0x378] sm:$0xff] }
  0x64   :  { %414 = vmatpush1.msra.mxu1 %v146_v36  ;;  %300 = vmatprep.subr.mxu0 %v145_v55  ;;  %v129_v7 = vld [vmem:[#allocation10 + $0x8] sm:$0xff]  ;;  %v238_v8 = vld [vmem:[#allocation10 + $0x370] sm:$0xff]  ;;  %v128_v9 = vld [vmem:[#allocation10] sm:$0xff] }
  0x65   :  { %415 = vmatprep.subr.mxu1 %v143_v38  ;;  %301 = vmatpush1.msra.mxu0 %v144_v57  ;;  %v235_v10 = vld [vmem:[#allocation10 + $0x358] sm:$0xff]  ;;  %v253_v11 = vld [vmem:[#allocation10 + $0x3e8] sm:$0xff]  ;;  %v234_v12 = vld [vmem:[#allocation10 + $0x350] sm:$0xff] }
  0x66   :  { %416 = vmatpush1.msra.mxu1 %v142_v40  ;;  %302 = vmatprep.subr.mxu0 %v141_v59  ;;  %v252_v13 = vld [vmem:[#allocation10 + $0x3e0] sm:$0xff]  ;;  %v231_v14 = vld [vmem:[#allocation10 + $0x338] sm:$0xff]  ;;  %v230_v16 = vld [vmem:[#allocation10 + $0x330] sm:$0xff] }
  0x67   :  { %417 = vmatprep.subr.mxu1 %v139_v42  ;;  %303 = vmatpush1.msra.mxu0 %v140_v61  ;;  %v2791_v15 = vld [vmem:[#allocation4 + $0x8] sm:$0xff]  ;;  %v249_v17 = vld [vmem:[#allocation10 + $0x3c8] sm:$0xff]  ;;  %v248_v19 = vld [vmem:[#allocation10 + $0x3c0] sm:$0xff] }
  0x68   :  { %418 = vmatpush1.msra.mxu1 %v138_v44  ;;  %304 = vmatprep.subr.mxu0 %v137_v63  ;;  %v227_v18 = vld [vmem:[#allocation10 + $0x318] sm:$0xff]  ;;  %v226_v20 = vld [vmem:[#allocation10 + $0x310] sm:$0xff]  ;;  %v245_v21 = vld [vmem:[#allocation10 + $0x3a8] sm:$0xff] }
  0x69   :  { %419 = vmatprep.subr.mxu1 %v135_v46  ;;  %305 = vmatpush1.msra.mxu0 %v136_v1  ;;  %v223_v22 = vld [vmem:[#allocation10 + $0x2f8] sm:$0xff]  ;;  %v244_v23 = vld [vmem:[#allocation10 + $0x3a0] sm:$0xff]  ;;  %v222_v24 = vld [vmem:[#allocation10 + $0x2f0] sm:$0xff] }
  0x6a   :  { %420 = vmatpush1.msra.mxu1 %v134_v48  ;;  %306 = vmatprep.subr.mxu0 %v133_v3  ;;  %v241_v25 = vld [vmem:[#allocation10 + $0x388] sm:$0xff]  ;;  %v219_v26 = vld [vmem:[#allocation10 + $0x2d8] sm:$0xff]  ;;  %v240_v27 = vld [vmem:[#allocation10 + $0x380] sm:$0xff] }
  0x6b   :  { %421 = vmatprep.subr.mxu1 %v131_v50  ;;  %307 = vmatpush1.msra.mxu0 %v132_v5  ;;  %v218_v28 = vld [vmem:[#allocation10 + $0x2d0] sm:$0xff]  ;;  %v237_v29 = vld [vmem:[#allocation10 + $0x368] sm:$0xff]  ;;  %v215_v30 = vld [vmem:[#allocation10 + $0x2b8] sm:$0xff] }
  0x6c   :  { %422 = vmatpush1.msra.mxu1 %v130_v52  ;;  %308 = vmatprep.subr.mxu0 %v129_v7  ;;  %v236_v31 = vld [vmem:[#allocation10 + $0x360] sm:$0xff]  ;;  %v214_v32 = vld [vmem:[#allocation10 + $0x2b0] sm:$0xff]  ;;  %v233_v33 = vld [vmem:[#allocation10 + $0x348] sm:$0xff] }
  0x6d   :  { %423 = vmatprep.subr.mxu1 %v255_v54  ;;  %309 = vmatpush1.msra.mxu0 %v128_v9  ;;  %v211_v34 = vld [vmem:[#allocation10 + $0x298] sm:$0xff]  ;;  %v232_v35 = vld [vmem:[#allocation10 + $0x340] sm:$0xff]  ;;  %v210_v36 = vld [vmem:[#allocation10 + $0x290] sm:$0xff] }
  0x6e   :  { %424 = vmatpush2.msra.mxu1 %v254_v56  ;;  %310 = vmatprep.subr.mxu0 %v253_v11  ;;  %v229_v37 = vld [vmem:[#allocation10 + $0x328] sm:$0xff]  ;;  %v207_v38 = vld [vmem:[#allocation10 + $0x278] sm:$0xff]  ;;  %v228_v39 = vld [vmem:[#allocation10 + $0x320] sm:$0xff] }
  0x6f   :  { %425 = vmatprep.subr.mxu1 %v251_v58  ;;  %311 = vmatpush2.msra.mxu0 %v252_v13  ;;  %v206_v40 = vld [vmem:[#allocation10 + $0x270] sm:$0xff]  ;;  %v225_v41 = vld [vmem:[#allocation10 + $0x308] sm:$0xff]  ;;  %v203_v42 = vld [vmem:[#allocation10 + $0x258] sm:$0xff] }
  0x70   :  { %426 = vmatpush2.msra.mxu1 %v250_v60  ;;  %455 = vmatprep.mubr.f32.mxu1 %v2791_v15  ;;  %v224_v43 = vld [vmem:[#allocation10 + $0x300] sm:$0xff]  ;;  %v202_v44 = vld [vmem:[#allocation10 + $0x250] sm:$0xff]  ;;  %v221_v45 = vld [vmem:[#allocation10 + $0x2e8] sm:$0xff] }
  0x71   :  { %427 = vmatprep.subr.mxu1 %v247_v62  ;;  %312 = vmatprep.subr.mxu0 %v249_v17  ;;  %v199_v46 = vld [vmem:[#allocation10 + $0x238] sm:$0xff]  ;;  %v220_v47 = vld [vmem:[#allocation10 + $0x2e0] sm:$0xff]  ;;  %v198_v48 = vld [vmem:[#allocation10 + $0x230] sm:$0xff] }
  0x72   :  { %428 = vmatpush2.msra.mxu1 %v246_v0  ;;  %313 = vmatpush2.msra.mxu0 %v248_v19  ;;  %v217_v49 = vld [vmem:[#allocation10 + $0x2c8] sm:$0xff]  ;;  %v195_v50 = vld [vmem:[#allocation10 + $0x218] sm:$0xff]  ;;  %v216_v51 = vld [vmem:[#allocation10 + $0x2c0] sm:$0xff] }
  0x73   :  { %429 = vmatprep.subr.mxu1 %v243_v2  ;;  %314 = vmatprep.subr.mxu0 %v245_v21  ;;  %v194_v52 = vld [vmem:[#allocation10 + $0x210] sm:$0xff]  ;;  %v213_v53 = vld [vmem:[#allocation10 + $0x2a8] sm:$0xff]  ;;  %v2798_v56 = vld [vmem:[#allocation12 + $0x1e0] sm:$0xff] }
  0x74   :  { %430 = vmatpush2.msra.mxu1 %v242_v4  ;;  %315 = vmatpush2.msra.mxu0 %v244_v23  ;;  %v2794_v54 = vld [vmem:[#allocation4] sm:$0xff]  ;;  %v2796_v55 = vld [vmem:[#allocation12 + $0x1e8] sm:$0xff]  ;;  %v212_v59 = vld [vmem:[#allocation10 + $0x2a0] sm:$0xff] }
  0x75   :  { %431 = vmatprep.subr.mxu1 %v239_v6  ;;  %316 = vmatprep.subr.mxu0 %v241_v25  ;;  %4011 = vst [vmem:[#allocation25_spill] sm:$0xff] %v2796_v55  ;;  %v2800_v57 = vld [vmem:[#allocation4 + $0x18] sm:$0xff]  ;;  %v2806_v60 = vld [vmem:[#allocation12 + $0x1c0] sm:$0xff]  ;;  %v2817_v1 = vld [vmem:[#allocation4 + $0x28] sm:$0xff] }
  0x76   :  { %432 = vmatpush2.msra.mxu1 %v238_v8  ;;  %317 = vmatpush2.msra.mxu0 %v240_v27  ;;  %v2802_v58 = vld [vmem:[#allocation12 + $0x1c8] sm:$0xff]  ;;  %v2810_v62 = vld [vmem:[#allocation4 + $0x10] sm:$0xff]  ;;  %v2828_v6 = vld [vmem:[#allocation4 + $0x20] sm:$0xff] }
  0x77   :  { %433 = vmatprep.subr.mxu1 %v235_v10  ;;  %318 = vmatprep.subr.mxu0 %v237_v29  ;;  %v209_v61 = vld [vmem:[#allocation10 + $0x288] sm:$0xff]  ;;  %v2815_v0 = vld [vmem:[#allocation12 + $0x1a0] sm:$0xff]  ;;  %v2864_v23 = vld [vmem:[#allocation4 + $0x40] sm:$0xff] }
  0x78   :  { %434 = vmatpush2.msra.mxu1 %v234_v12  ;;  %319 = vmatpush2.msra.mxu0 %v236_v31  ;;  %v2812_v63 = vld [vmem:[#allocation12 + $0x1a8] sm:$0xff]  ;;  %v208_v3 = vld [vmem:[#allocation10 + $0x280] sm:$0xff] }
  0x79   :  { %435 = vmatprep.subr.mxu1 %v231_v14  ;;  %320 = vmatprep.subr.mxu0 %v233_v33  ;;  %v2820_v2 = vld [vmem:[#allocation12 + $0x188] sm:$0xff]  ;;  %v2824_v4 = vld [vmem:[#allocation12 + $0x180] sm:$0xff] }
  0x7a   :  { %436 = vmatpush2.msra.mxu1 %v230_v16  ;;  %321 = vmatpush2.msra.mxu0 %v232_v35  ;;  %v205_v5 = vld [vmem:[#allocation10 + $0x268] sm:$0xff]  ;;  %v2833_v8 = vld [vmem:[#allocation12 + $0x160] sm:$0xff] }
  0x7b   :  { %437 = vmatprep.subr.mxu1 %v227_v18  ;;  %322 = vmatprep.subr.mxu0 %v229_v37  ;;  %v2830_v7 = vld [vmem:[#allocation12 + $0x168] sm:$0xff]  ;;  %v204_v11 = vld [vmem:[#allocation10 + $0x260] sm:$0xff]  ;;  %v2853_v18 = vld [vmem:[#allocation4 + $0x48] sm:$0xff] }
  0x7c   :  { %438 = vmatpush2.msra.mxu1 %v226_v20  ;;  %323 = vmatpush2.msra.mxu0 %v228_v39  ;;  %v2835_v9 = vld [vmem:[#allocation4 + $0x38] sm:$0xff]  ;;  %v2842_v12 = vld [vmem:[#allocation12 + $0x140] sm:$0xff] }
  0x7d   :  { %439 = vmatprep.subr.mxu1 %v223_v22  ;;  %324 = vmatprep.subr.mxu0 %v225_v41  ;;  %v2838_v10 = vld [vmem:[#allocation12 + $0x148] sm:$0xff]  ;;  %4012 = vst [vmem:[#allocation26_spill] sm:$0xff] %v2842_v12  ;;  %v2846_v14 = vld [vmem:[#allocation4 + $0x30] sm:$0xff] }
  0x7e   :  { %440 = vmatpush2.msra.mxu1 %v222_v24  ;;  %325 = vmatpush2.msra.mxu0 %v224_v43  ;;  %v201_v13 = vld [vmem:[#allocation10 + $0x248] sm:$0xff]  ;;  %v2851_v17 = vld [vmem:[#allocation12 + $0x120] sm:$0xff] }
  0x7f   :  { %441 = vmatprep.subr.mxu1 %v219_v26  ;;  %326 = vmatprep.subr.mxu0 %v221_v45  ;;  %v2848_v16 = vld [vmem:[#allocation12 + $0x128] sm:$0xff]  ;;  %4014 = vst [vmem:[#allocation28_spill] sm:$0xff] %v2851_v17  ;;  %v200_v20 = vld [vmem:[#allocation10 + $0x240] sm:$0xff] }
  0x80   :  { %442 = vmatpush2.msra.mxu1 %v218_v28  ;;  %327 = vmatpush2.msra.mxu0 %v220_v47  ;;  %4013 = vst [vmem:[#allocation27_spill] sm:$0xff] %v2848_v16  ;;  %v2856_v19 = vld [vmem:[#allocation12 + $0x108] sm:$0xff]  ;;  %v2860_v21 = vld [vmem:[#allocation12 + $0x100] sm:$0xff] }
  0x81   :  { %443 = vmatprep.subr.mxu1 %v215_v30  ;;  %328 = vmatprep.subr.mxu0 %v217_v49  ;;  %4015 = vst [vmem:[#allocation29_spill] sm:$0xff] %v2856_v19  ;;  %4016 = vst [vmem:[#allocation30_spill] sm:$0xff] %v2860_v21  ;;  %v197_v22 = vld [vmem:[#allocation10 + $0x228] sm:$0xff]  ;;  %v2869_v25 = vld [vmem:[#allocation12 + $0xe0] sm:$0xff] }
  0x82   :  { %444 = vmatpush2.msra.mxu1 %v214_v32  ;;  %329 = vmatpush2.msra.mxu0 %v216_v51  ;;  %v2866_v24 = vld [vmem:[#allocation12 + $0xe8] sm:$0xff]  ;;  %4018 = vst [vmem:[#allocation32_spill] sm:$0xff] %v2869_v25  ;;  %v196_v28 = vld [vmem:[#allocation10 + $0x220] sm:$0xff]  ;;  %v2937_v49 = vld [vmem:[#allocation7] sm:$0xff] }
  0x83   :  { %445 = vmatprep.subr.mxu1 %v211_v34  ;;  %330 = vmatprep.subr.mxu0 %v213_v53  ;;  %4017 = vst [vmem:[#allocation31_spill] sm:$0xff] %v2866_v24  ;;  %v2871_v26 = vld [vmem:[#allocation4 + $0x58] sm:$0xff]  ;;  %v2878_v29 = vld [vmem:[#allocation12 + $0xc0] sm:$0xff]  ;;  %v2889_v34 = vld [vmem:[#allocation4 + $0x68] sm:$0xff] }
  0x84   :  { %446 = vmatpush2.msra.mxu1 %v210_v36  ;;  %331 = vmatpush2.msra.mxu0 %v212_v59  ;;  %v2874_v27 = vld [vmem:[#allocation12 + $0xc8] sm:$0xff]  ;;  %v2882_v31 = vld [vmem:[#allocation4 + $0x50] sm:$0xff]  ;;  %v2942_v51 = vld [vmem:[#allocation12 + $0x1f0] sm:$0xff] }
  0x85   :  { %447 = vmatprep.subr.mxu1 %v207_v38  ;;  %332 = vmatprep.subr.mxu0 %v209_v61  ;;  %v193_v30 = vld [vmem:[#allocation10 + $0x208] sm:$0xff]  ;;  %v2887_v33 = vld [vmem:[#allocation12 + $0xa0] sm:$0xff]  ;;  %v2900_v38 = vld [vmem:[#allocation4 + $0x60] sm:$0xff] }
  0x86   :  { %448 = vmatpush2.msra.mxu1 %v206_v40  ;;  %333 = vmatpush2.msra.mxu0 %v208_v3  ;;  %v2884_v32 = vld [vmem:[#allocation12 + $0xa8] sm:$0xff]  ;;  %v192_v36 = vld [vmem:[#allocation10 + $0x200] sm:$0xff]  ;;  %v2951_v53 = vld [vmem:[#allocation12 + $0x1d0] sm:$0xff] }
  0x87   :  { %449 = vmatprep.subr.mxu1 %v203_v42  ;;  %334 = vmatprep.subr.mxu0 %v205_v5  ;;  %v2892_v35 = vld [vmem:[#allocation12 + $0x88] sm:$0xff]  ;;  %v2896_v37 = vld [vmem:[#allocation12 + $0x80] sm:$0xff]  ;;  %v2958_v59 = vld [vmem:[#allocation12 + $0x1b0] sm:$0xff] }
  0x88   :  { %450 = vmatpush2.msra.mxu1 %v202_v44  ;;  %335 = vmatpush2.msra.mxu0 %v204_v11  ;;  %4019 = vst [vmem:[#allocation33_spill] sm:$0xff] %v2896_v37  ;;  %v2902_v39 = vld [vmem:[#allocation12 + $0x68] sm:$0xff]  ;;  %v2905_v40 = vld [vmem:[#allocation12 + $0x60] sm:$0xff]  ;;  %v2966_v61 = vld [vmem:[#allocation12 + $0x190] sm:$0xff] }
  0x89   :  { %451 = vmatprep.subr.mxu1 %v199_v46  ;;  %336 = vmatprep.subr.mxu0 %v201_v13  ;;  %4020 = vst [vmem:[#allocation34_spill] sm:$0xff] %v2902_v39  ;;  %4021 = vst [vmem:[#allocation35_spill] sm:$0xff] %v2905_v40  ;;  %v2907_v41 = vld [vmem:[#allocation4 + $0x78] sm:$0xff]  ;;  %v2915_v43 = vld [vmem:[#allocation12 + $0x40] sm:$0xff] }
  0x8a   :  { %452 = vmatpush2.msra.mxu1 %v198_v48  ;;  %337 = vmatpush2.msra.mxu0 %v200_v20  ;;  %v2910_v42 = vld [vmem:[#allocation12 + $0x48] sm:$0xff]  ;;  %4023 = vst [vmem:[#allocation37_spill] sm:$0xff] %v2915_v43  ;;  %v2919_v44 = vld [vmem:[#allocation4 + $0x70] sm:$0xff]  ;;  %v3907_v48 = vmov 0.0   ;;  %v2970_v3 = vld [vmem:[#allocation12 + $0x178] sm:$0xff] }
  0x8b   :  { %453 = vmatprep.subr.mxu1 %v195_v50  ;;  %338 = vmatprep.subr.mxu0 %v197_v22  ;;  %4022 = vst [vmem:[#allocation36_spill] sm:$0xff] %v2910_v42  ;;  %v2921_v45 = vld [vmem:[#allocation12 + $0x28] sm:$0xff]  ;;  %v2924_v46 = vld [vmem:[#allocation12 + $0x20] sm:$0xff]  ;;  %v2939_v50 = vld [vmem:[#allocation12 + $0x1f8] sm:$0xff] }
  0x8c   :  { %454 = vmatpush2.msra.mxu1 %v194_v52  ;;  %339 = vmatpush2.msra.mxu0 %v196_v28  ;;  %4024 = vst [vmem:[#allocation38_spill] sm:$0xff] %v2921_v45  ;;  %4025 = vst [vmem:[#allocation39_spill] sm:$0xff] %v2924_v46  ;;  %v2933_v47 = vld [vmem:[#allocation12] sm:$0xff]  ;;  %v2946_v52 = vld [vmem:[#allocation12 + $0x1d8] sm:$0xff] }
  0x8d   :  { %456 = vmatmul.mubr.f32.vlgmr.msra.gmra.mxu1 %v2794_v54  ;;  %609 = vmatprep.subr.mxu1 %v2796_v55  ;;  %4027 = vst [vmem:[#allocation41_spill] sm:$0xff] %v2933_v47  ;;  %4028 = vst [vmem:[#allocation42_spill] sm:$0xff] %v2939_v50  ;;  %v2974_v5 = vld [vmem:[#allocation12 + $0x170] sm:$0xff]  ;;  %v2986_v13 = vld [vmem:[#allocation12 + $0x138] sm:$0xff] }
  0x8e   :  { %610 = vmatpush1.msra.mxu1 %v2798_v56  ;;  %461 = vmatprep.mubr.f32.mxu1 %v2800_v57  ;;  %v2982_v11 = vld [vmem:[#allocation12 + $0x150] sm:$0xff] }
  0x8f   :  { %611 = vmatprep.subr.mxu1 %v2802_v58  ;;  %340 = vmatprep.subr.mxu0 %v193_v30  ;;  %v2990_v20 = vld [vmem:[#allocation12 + $0x130] sm:$0xff]  ;;  %v3010_v30 = vld [vmem:[#allocation12 + $0xd8] sm:$0xff] }
  0x90   :  { %612 = vmatpush1.msra.mxu1 %v2806_v60  ;;  %341 = vmatpush2.msra.mxu0 %v192_v36  ;;  %v2998_v22 = vld [vmem:[#allocation12 + $0x110] sm:$0xff] }
  0x91   :  { %462 = vmatmul.mubr.f32.gmra.mxu1 %v2810_v62  ;;  %613 = vmatprep.subr.mxu1 %v2812_v63  ;;  %v3006_v28 = vld [vmem:[#allocation12 + $0xf0] sm:$0xff] }
  0x92   :  { %614 = vmatpush1.msra.mxu1 %v2815_v0  ;;  %467 = vmatprep.mubr.f32.mxu1 %v2817_v1  ;;  %v3014_v36 = vld [vmem:[#allocation12 + $0xd0] sm:$0xff] }
  0x93   :  { %615 = vmatprep.subr.mxu1 %v2820_v2  ;;  %342 = vmatprep.mubr.f32.mxu0 %v2791_v15  ;;  %v2928_v15 = vld [vmem:[#allocation12 + $0x8] sm:$0xff] }
  0x94   :  { %616 = vmatpush1.msra.mxu1 %v2824_v4  ;;  %343 = vmatmul.mubr.f32.vlgmr.msra.gmra.mxu0 %v2794_v54  ;;  %4026 = vst [vmem:[#allocation40_spill] sm:$0xff] %v2928_v15  ;;  %v2954_v54 = vld [vmem:[#allocation12 + $0x1b8] sm:$0xff] }
  0x95   :  { %468 = vmatmul.mubr.f32.gmra.mxu1 %v2828_v6  ;;  %617 = vmatprep.subr.mxu1 %v2830_v7 }
  0x96   :  { %618 = vmatpush1.msra.mxu1 %v2833_v8  ;;  %473 = vmatprep.mubr.f32.mxu1 %v2835_v9 }
  0x97   :  { %619 = vmatprep.subr.mxu1 %v2838_v10  ;;  %787 = vmatprep.subr.mxu0 %v2796_v55 }
  0x98   :  { %620 = vmatpush1.msra.mxu1 %v2842_v12  ;;  %788 = vmatpush1.msra.mxu0 %v2798_v56 }
  0x99   :  { %474 = vmatmul.mubr.f32.gmra.mxu1 %v2846_v14  ;;  %621 = vmatprep.subr.mxu1 %v2848_v16 }
  0x9a   :  { %622 = vmatpush1.msra.mxu1 %v2851_v17  ;;  %479 = vmatprep.mubr.f32.mxu1 %v2853_v18 }
  0x9b   :  { %623 = vmatprep.subr.mxu1 %v2856_v19  ;;  %348 = vmatprep.mubr.f32.mxu0 %v2800_v57  ;;  %v2962_v57 = vld [vmem:[#allocation12 + $0x198] sm:$0xff] }
  0x9c   :  { %624 = vmatpush1.msra.mxu1 %v2860_v21  ;;  %789 = vmatprep.subr.mxu0 %v2802_v58 }
  0x9d   :  { %480 = vmatmul.mubr.f32.gmra.mxu1 %v2864_v23  ;;  %625 = vmatprep.subr.mxu1 %v2866_v24 }
  0x9e   :  { %626 = vmatpush1.msra.mxu1 %v2869_v25  ;;  %485 = vmatprep.mubr.f32.mxu1 %v2871_v26 }
  0x9f   :  { %627 = vmatprep.subr.mxu1 %v2874_v27  ;;  %349 = vmatmul.mubr.f32.gmra.mxu0 %v2810_v62  ;;  %v2978_v62 = vld [vmem:[#allocation12 + $0x158] sm:$0xff] }
  0xa0   :  { %628 = vmatpush1.msra.mxu1 %v2878_v29  ;;  %790 = vmatpush1.msra.mxu0 %v2806_v60 }
  0xa1   :  { %486 = vmatmul.mubr.f32.gmra.mxu1 %v2882_v31  ;;  %629 = vmatprep.subr.mxu1 %v2884_v32 }
  0xa2   :  { %630 = vmatpush1.msra.mxu1 %v2887_v33  ;;  %491 = vmatprep.mubr.f32.mxu1 %v2889_v34 }
  0xa3   :  { %631 = vmatprep.subr.mxu1 %v2892_v35  ;;  %791 = vmatprep.subr.mxu0 %v2812_v63 }
  0xa4   :  { %632 = vmatpush1.msra.mxu1 %v2896_v37  ;;  %792 = vmatpush1.msra.mxu0 %v2815_v0 }
  0xa5   :  { %492 = vmatmul.mubr.f32.gmra.mxu1 %v2900_v38  ;;  %633 = vmatprep.subr.mxu1 %v2902_v39 }
  0xa6   :  { %634 = vmatpush1.msra.mxu1 %v2905_v40  ;;  %497 = vmatprep.mubr.f32.mxu1 %v2907_v41 }
  0xa7   :  { %635 = vmatprep.subr.mxu1 %v2910_v42  ;;  %354 = vmatprep.mubr.f32.mxu0 %v2817_v1  ;;  %v2994_v1 = vld [vmem:[#allocation12 + $0x118] sm:$0xff] }
  0xa8   :  { %636 = vmatpush1.msra.mxu1 %v2915_v43  ;;  %793 = vmatprep.subr.mxu0 %v2820_v2 }
  0xa9   :  { %498 = vmatmul.mubr.f32.gmra.mxu1 %v2919_v44  ;;  %637 = vmatprep.subr.mxu1 %v2921_v45 }
  0xaa   :  { %638 = vmatpush1.msra.mxu1 %v2924_v46  ;;  %673 = vmatprep.mubr.f32.mxu1 %v3907_v48 }
  0xab   :  { %639 = vmatprep.subr.mxu1 %v2928_v15  ;;  %355 = vmatmul.mubr.f32.gmra.mxu0 %v2828_v6  ;;  %v3002_v6 = vld [vmem:[#allocation12 + $0xf8] sm:$0xff] }
  0xac   :  { %640 = vmatpush1.msra.mxu1 %v2933_v47  ;;  %794 = vmatpush1.msra.mxu0 %v2824_v4 }
  0xad   :  { %674 = vmatmul.mubr.f32.vlgmr.msra.gmra.mxu1 %v2937_v49  ;;  %680 = vmatprep.subr.mxu1 %v2939_v50 }
  0xae   :  { %681 = vmatpush1.msra.mxu1 %v2942_v51  ;;  %744 = vmatprep.mubr.f32.mxu1 %v3907_v48  ;;  %v3022_v48 = vld [vmem:[#allocation12 + $0xb0] sm:$0xff] }
  0xaf   :  { %682 = vmatprep.subr.mxu1 %v2946_v52  ;;  %795 = vmatprep.subr.mxu0 %v2830_v7 }
  0xb0   :  { %683 = vmatpush1.msra.mxu1 %v2951_v53  ;;  %796 = vmatpush1.msra.mxu0 %v2833_v8 }
  0xb1   :  { %684 = vmatprep.subr.mxu1 %v2954_v54  ;;  %360 = vmatprep.mubr.f32.mxu0 %v2835_v9  ;;  %v3018_v9 = vld [vmem:[#allocation12 + $0xb8] sm:$0xff] }
  0xb2   :  { %685 = vmatpush1.msra.mxu1 %v2958_v59  ;;  %797 = vmatprep.subr.mxu0 %v2838_v10 }
  0xb3   :  { %686 = vmatprep.subr.mxu1 %v2962_v57  ;;  %361 = vmatmul.mubr.f32.gmra.mxu0 %v2846_v14  ;;  %v3026_v14 = vld [vmem:[#allocation12 + $0x98] sm:$0xff] }
  0xb4   :  { %687 = vmatpush1.msra.mxu1 %v2966_v61  ;;  %798 = vmatpush1.msra.mxu0 %v2842_v12  ;;  %4029 = vst [vmem:[#allocation43_spill] sm:$0xff] %v3026_v14  ;;  %v3030_v12 = vld [vmem:[#allocation12 + $0x90] sm:$0xff] }
  0xb5   :  { %688 = vmatprep.subr.mxu1 %v2970_v3  ;;  %799 = vmatprep.subr.mxu0 %v2848_v16  ;;  %4030 = vst [vmem:[#allocation44_spill] sm:$0xff] %v3030_v12  ;;  %v3034_v16 = vld [vmem:[#allocation12 + $0x78] sm:$0xff] }
  0xb6   :  { %689 = vmatpush1.msra.mxu1 %v2974_v5  ;;  %800 = vmatpush1.msra.mxu0 %v2851_v17  ;;  %4031 = vst [vmem:[#allocation45_spill] sm:$0xff] %v3034_v16  ;;  %v3038_v17 = vld [vmem:[#allocation12 + $0x70] sm:$0xff] }
  0xb7   :  { %690 = vmatprep.subr.mxu1 %v2978_v62  ;;  %366 = vmatprep.mubr.f32.mxu0 %v2853_v18  ;;  %4032 = vst [vmem:[#allocation46_spill] sm:$0xff] %v3038_v17  ;;  %v3042_v18 = vld [vmem:[#allocation12 + $0x58] sm:$0xff] }
  0xb8   :  { %691 = vmatpush1.msra.mxu1 %v2982_v11  ;;  %801 = vmatprep.subr.mxu0 %v2856_v19  ;;  %4033 = vst [vmem:[#allocation47_spill] sm:$0xff] %v3042_v18  ;;  %v3046_v19 = vld [vmem:[#allocation12 + $0x50] sm:$0xff] }
  0xb9   :  { %692 = vmatprep.subr.mxu1 %v2986_v13  ;;  %367 = vmatmul.mubr.f32.gmra.mxu0 %v2864_v23  ;;  %4034 = vst [vmem:[#allocation48_spill] sm:$0xff] %v3046_v19  ;;  %v3050_v23 = vld [vmem:[#allocation12 + $0x38] sm:$0xff] }
  0xba   :  { %693 = vmatpush1.msra.mxu1 %v2990_v20  ;;  %802 = vmatpush1.msra.mxu0 %v2860_v21  ;;  %4035 = vst [vmem:[#allocation49_spill] sm:$0xff] %v3050_v23  ;;  %v3054_v21 = vld [vmem:[#allocation12 + $0x30] sm:$0xff] }
  0xbb   :  { %694 = vmatprep.subr.mxu1 %v2994_v1  ;;  %803 = vmatprep.subr.mxu0 %v2866_v24  ;;  %4036 = vst [vmem:[#allocation50_spill] sm:$0xff] %v3054_v21  ;;  %v3058_v24 = vld [vmem:[#allocation12 + $0x18] sm:$0xff] }
  0xbc   :  { %695 = vmatpush1.msra.mxu1 %v2998_v22  ;;  %804 = vmatpush1.msra.mxu0 %v2869_v25  ;;  %4037 = vst [vmem:[#allocation51_spill] sm:$0xff] %v3058_v24  ;;  %v3062_v25 = vld [vmem:[#allocation12 + $0x10] sm:$0xff] }
  0xbd   :  { %696 = vmatprep.subr.mxu1 %v3002_v6  ;;  %372 = vmatprep.mubr.f32.mxu0 %v2871_v26  ;;  %4038 = vst [vmem:[#allocation52_spill] sm:$0xff] %v3062_v25  ;;  %v4039_v26 = vmov 0.0  }
  0xbe   :  { %697 = vmatpush1.msra.mxu1 %v3006_v28  ;;  %805 = vmatprep.subr.mxu0 %v2874_v27 }
  0xbf   :  { %698 = vmatprep.subr.mxu1 %v3010_v30  ;;  %373 = vmatmul.mubr.f32.gmra.mxu0 %v2882_v31  ;;  %v258_v31 = vlaneseq }
  0xc0   :  { %699 = vmatpush1.msra.mxu1 %v3014_v36  ;;  %806 = vmatpush1.msra.mxu0 %v2878_v29 }
  0xc1   :  { %700 = vmatprep.subr.mxu1 %v3018_v9  ;;  %807 = vmatprep.subr.mxu0 %v2884_v32 }
  0xc2   :  { %701 = vmatpush1.msra.mxu1 %v3022_v48  ;;  %808 = vmatpush1.msra.mxu0 %v2887_v33 }
  0xc3   :  { %702 = vmatprep.subr.mxu1 %v3026_v14  ;;  %378 = vmatprep.mubr.f32.mxu0 %v2889_v34  ;;  %v3121_v34 = vshrl.u32 %v258_v31, 7 }
  0xc4   :  { %703 = vmatpush1.msra.mxu1 %v3030_v12  ;;  %809 = vmatprep.subr.mxu0 %v2892_v35 }
  0xc5   :  { %704 = vmatprep.subr.mxu1 %v3034_v16  ;;  %379 = vmatmul.mubr.f32.gmra.mxu0 %v2900_v38  ;;  %4040 = vst [vmem:[#allocation53_spill] sm:$0xff] %v3121_v34  ;;  %v268_v38 = vsub.s32 2, %v3121_v34 }
  0xc6   :  { %705 = vmatpush1.msra.mxu1 %v3038_v17  ;;  %810 = vmatpush1.msra.mxu0 %v2896_v37 }
  0xc7   :  { %706 = vmatprep.subr.mxu1 %v3042_v18  ;;  %811 = vmatprep.subr.mxu0 %v2902_v39 }
  0xc8   :  { %707 = vmatpush1.msra.mxu1 %v3046_v19  ;;  %812 = vmatpush1.msra.mxu0 %v2905_v40 }
  0xc9   :  { %708 = vmatprep.subr.mxu1 %v3050_v23  ;;  %384 = vmatprep.mubr.f32.mxu0 %v2907_v41  ;;  %v256_v41 = vld [vmem:[%s3900_s4] sm:$0xf] }
  0xca   :  { %709 = vmatpush1.msra.mxu1 %v3054_v21  ;;  %813 = vmatprep.subr.mxu0 %v2910_v42 }
  0xcb   :  { %710 = vmatprep.subr.mxu1 %v3058_v24  ;;  %385 = vmatmul.mubr.f32.gmra.mxu0 %v2919_v44 }
  0xcc   :  { %711 = vmatpush1.msra.mxu1 %v3062_v25  ;;  %814 = vmatpush1.msra.mxu0 %v2915_v43 }
  0xcd   :  { %745 = vmatmul.mubr.f32.vlgmr.msra.gmra.mxu1 %v2937_v49  ;;  %858 = vmatprep.subr.mxu1 %v2939_v50  ;;  %v272_v49 = vsub.s32 3, %v3121_v34 }
  0xce   :  { %859 = vmatpush1.msra.mxu1 %v2942_v51  ;;  %815 = vmatprep.subr.mxu0 %v2921_v45 }
  0xcf   :  { %860 = vmatprep.subr.mxu1 %v2946_v52  ;;  %816 = vmatpush1.msra.mxu0 %v2924_v46 }
  0xd0   :  { %861 = vmatpush1.msra.mxu1 %v2951_v53  ;;  %817 = vmatprep.subr.mxu0 %v2928_v15 }
  0xd1   :  { %862 = vmatprep.subr.mxu1 %v2954_v54  ;;  %818 = vmatpush1.msra.mxu0 %v2933_v47  ;;  %v3134_v47 = vrot.slane %v256_v41, %v272_v49 }
  0xd2   :  { %863 = vmatpush1.msra.mxu1 %v2958_v59  ;;  %851 = vmatprep.mubr.f32.mxu0 %v4039_v26 }
  0xd3   :  { %864 = vmatprep.subr.mxu1 %v2962_v57  ;;  %922 = vmatprep.mubr.f32.mxu1 %v4039_v26  ;;  %v3132_v26 = vrot.slane %v256_v41, %v268_v38 }
  0xd4   :  { %865 = vmatpush1.msra.mxu1 %v2966_v61  ;;  %966 = vmatprep.subr.mxu0 %v2796_v55 }
  0xd5   :  { %866 = vmatprep.subr.mxu1 %v2970_v3 }
  0xd6   :  { %867 = vmatpush1.msra.mxu1 %v2974_v5 }
  0xd7   :  { %868 = vmatprep.subr.mxu1 %v2978_v62 }
  0xd8   :  { %869 = vmatpush1.msra.mxu1 %v2982_v11 }
  0xd9   :  { %870 = vmatprep.subr.mxu1 %v2986_v13 }
  0xda   :  { %871 = vmatpush1.msra.mxu1 %v2990_v20 }
  0xdb   :  { %872 = vmatprep.subr.mxu1 %v2994_v1 }
  0xdc   :  { %873 = vmatpush1.msra.mxu1 %v2998_v22 }
  0xdd   :  { %874 = vmatprep.subr.mxu1 %v3002_v6 }
  0xde   :  { %875 = vmatpush1.msra.mxu1 %v3006_v28 }
  0xdf   :  { %876 = vmatprep.subr.mxu1 %v3010_v30 }
  0xe0   :  { %877 = vmatpush1.msra.mxu1 %v3014_v36 }
  0xe1   :  { %878 = vmatprep.subr.mxu1 %v3018_v9 }
  0xe2   :  { %879 = vmatpush1.msra.mxu1 %v3022_v48 }
  0xe3   :  { %880 = vmatprep.subr.mxu1 %v3026_v14 }
  0xe4   :  { %881 = vmatpush1.msra.mxu1 %v3030_v12 }
  0xe5   :  { %882 = vmatprep.subr.mxu1 %v3034_v16 }
  0xe6   :  { %883 = vmatpush1.msra.mxu1 %v3038_v17 }
  0xe7   :  { %884 = vmatprep.subr.mxu1 %v3042_v18 }
  0xe8   :  { %885 = vmatpush1.msra.mxu1 %v3046_v19 }
  0xe9   :  { %886 = vmatprep.subr.mxu1 %v3050_v23 }
  0xea   :  { %887 = vmatpush1.msra.mxu1 %v3054_v21 }
  0xeb   :  { %888 = vmatprep.subr.mxu1 %v3058_v24 }
  0xec   :  { %889 = vmatpush1.msra.mxu1 %v3062_v25 }
  0xed   :  { %1037 = vmatprep.subr.mxu1 %v2939_v50 }
 0x14d   :  { %v3127_v44 = vpop.f32.mrf.mxu1 }
 0x14f   :  { %v3130_v55 = vpop.f32.mrf.mxu1 }
 0x151   :  { %v463_v25 = vpop.f32.mrf.mxu1 }
 0x152   :  { %v3137_v31 = vadd.f32 %v463_v25, %v3132_v26 }
 0x153   :  { %v465_v50 = vpop.f32.mrf.mxu1 }
 0x154   :  { %4041 = vst [vmem:[#allocation54_spill] sm:$0xff] %v3137_v31  ;;  %v3140_v24 = vadd.f32 %v465_v50, %v3134_v47 }
 0x155   :  { %v469_v15 = vpop.f32.mrf.mxu1 }
 0x156   :  { %4042 = vst [vmem:[#allocation55_spill] sm:$0xff] %v3140_v24  ;;  %v3143_v21 = vadd.f32 %v469_v15, %v3132_v26 }
 0x157   :  { %v471_v46 = vpop.f32.mrf.mxu1 }
 0x158   :  { %4043 = vst [vmem:[#allocation56_spill] sm:$0xff] %v3143_v21  ;;  %v3146_v23 = vadd.f32 %v471_v46, %v3134_v47 }
 0x159   :  { %v475_v38 = vpop.f32.mrf.mxu1 }
 0x15a   :  { %4044 = vst [vmem:[#allocation57_spill] sm:$0xff] %v3146_v23  ;;  %v3149_v45 = vadd.f32 %v475_v38, %v3132_v26 }
 0x15b   :  { %v477_v49 = vpop.f32.mrf.mxu1 }
 0x15c   :  { %4045 = vst [vmem:[#allocation58_spill] sm:$0xff] %v3149_v45  ;;  %v3152_v25 = vadd.f32 %v477_v49, %v3134_v47 }
 0x15d   :  { %v481_v31 = vpop.f32.mrf.mxu1 }
 0x15e   :  { %4046 = vst [vmem:[#allocation59_spill] sm:$0xff] %v3152_v25  ;;  %v3155_v50 = vadd.f32 %v481_v31, %v3132_v26 }
 0x15f   :  { %v483_v24 = vpop.f32.mrf.mxu1 }
 0x160   :  { %4047 = vst [vmem:[#allocation60_spill] sm:$0xff] %v3155_v50  ;;  %v3158_v15 = vadd.f32 %v483_v24, %v3134_v47  ;;  %v3949_v50 = vsub.s32 0, %v3121_v34 }
 0x161   :  { %v487_v21 = vpop.f32.mrf.mxu1 }
 0x162   :  { %4048 = vst [vmem:[#allocation61_spill] sm:$0xff] %v3158_v15  ;;  %v3161_v46 = vadd.f32 %v487_v21, %v3132_v26  ;;  %v3956_v15 = vsub.s32 1, %v3121_v34 }
 0x163   :  { %v489_v23 = vpop.f32.mrf.mxu1 }
 0x164   :  { %4049 = vst [vmem:[#allocation62_spill] sm:$0xff] %v3161_v46  ;;  %v3164_v38 = vadd.f32 %v489_v23, %v3134_v47  ;;  %v344_v46 = vpop.f32.mrf.mxu0  ;;  %v3179_v23 = vrot.slane %v256_v41, %v3949_v50 }
 0x165   :  { %v493_v45 = vpop.f32.mrf.mxu1 }
 0x166   :  { %4050 = vst [vmem:[#allocation63_spill] sm:$0xff] %v3164_v38  ;;  %v3167_v49 = vadd.f32 %v493_v45, %v3132_v26  ;;  %v345_v38 = vadd.f32 %v344_v46, %v3179_v23 }
 0x167   :  { %v495_v25 = vpop.f32.mrf.mxu1 }
 0x168   :  { %4051 = vst [vmem:[#allocation64_spill] sm:$0xff] %v3167_v49  ;;  %v3170_v31 = vadd.f32 %v495_v25, %v3134_v47  ;;  %v3186_v25 = vrot.slane %v256_v41, %v3956_v15 }
 0x169   :  { %v499_v24 = vpop.f32.mrf.mxu1 }
 0x16a   :  { %4052 = vst [vmem:[#allocation65_spill] sm:$0xff] %v3170_v31  ;;  %v3175_v21 = vadd.f32 %v499_v24, %v3132_v26  ;;  %4055 = vst [vmem:[#allocation68_spill] sm:$0xff] %v3186_v25  ;;  %v346_v31 = vpop.f32.mrf.mxu0 }
 0x16b   :  { %v501_v19 = vpop.f32.mrf.mxu1  ;;  %v347_v24 = vadd.f32 %v346_v31, %v3186_v25 }
 0x16c   :  { %4053 = vst [vmem:[#allocation66_spill] sm:$0xff] %v3175_v21  ;;  %v3182_v45 = vadd.f32 %v501_v19, %v3134_v47  ;;  %v3189_v43 = vpop.f32.mrf.mxu0 }
 0x16d   :  { %v675_v49 = vpop.f32.mrf.mxu1  ;;  %4056 = vst [vmem:[#allocation69_spill] sm:$0xff] %v3189_v43 }
 0x16e   :  { %4054 = vst [vmem:[#allocation67_spill] sm:$0xff] %v3182_v45  ;;  %v3192_v18 = vpop.f32.mrf.mxu0  ;;  %v751_v50 = vadd.f32 %v675_v49, %v345_v38 }
 0x16f   :  { %v677_v21 = vpop.f32.mrf.mxu1 }
 0x170   :  { %v752_v42 = vadd.f32 %v677_v21, %v347_v24  ;;  %v356_v17 = vpop.f32.mrf.mxu0  ;;  %v2270_v34 = vmul.f32 -1.442695, %v751_v50 }
 0x171   :  { %v3195_v19 = vadd.f32 %v356_v17, %v3179_v23 }
 0x172   :  { %v358_v41 = vpop.f32.mrf.mxu0  ;;  %v2271_v15 = vmul.f32 -1.442695, %v752_v42  ;;  %2308 = vpow2.f32 %v2270_v34 }
 0x173   :  { %4057 = vst [vmem:[#allocation70_spill] sm:$0xff] %v3195_v19  ;;  %v3198_v45 = vadd.f32 %v358_v41, %v3186_v25 }
 0x174   :  { %v362_v46 = vpop.f32.mrf.mxu0  ;;  %2310 = vpow2.f32 %v2271_v15 }
 0x175   :  { %4058 = vst [vmem:[#allocation71_spill] sm:$0xff] %v3198_v45  ;;  %v3201_v31 = vadd.f32 %v362_v46, %v3179_v23 }
 0x176   :  { %v364_v43 = vpop.f32.mrf.mxu0 }
 0x177   :  { %4059 = vst [vmem:[#allocation72_spill] sm:$0xff] %v3201_v31  ;;  %v3204_v38 = vadd.f32 %v364_v43, %v3186_v25  ;;  %v458_v43 = vadd.f32 %v3127_v44, %v3132_v26 }
 0x179   :  { %4060 = vst [vmem:[#allocation73_spill] sm:$0xff] %v3204_v38  ;;  %v368_v49 = vpop.f32.mrf.mxu0 }
 0x17a   :  { %v3207_v17 = vadd.f32 %v368_v49, %v3179_v23 }
 0x17b   :  { %v370_v50 = vpop.f32.mrf.mxu0 }
 0x17c   :  { %4061 = vst [vmem:[#allocation74_spill] sm:$0xff] %v3207_v17  ;;  %v3210_v42 = vadd.f32 %v370_v50, %v3186_v25  ;;  %v460_v50 = vadd.f32 %v3130_v55, %v3134_v47 }
 0x17e   :  { %4062 = vst [vmem:[#allocation75_spill] sm:$0xff] %v3210_v42 }
 0x17f   :  { %v374_v21 = vpop.f32.mrf.mxu0  ;;  %v2309_v24 = vpop.eup %2308 }
 0x180   :  { %v3213_v34 = vadd.f32 %v374_v21, %v3179_v23  ;;  %v764_v38 = vadd.f32 1.0, %v2309_v24 }
 0x181   :  { %v2311_v15 = vpop.eup %2310  ;;  %v376_v41 = vpop.f32.mrf.mxu0 }
 0x182   :  { %4063 = vst [vmem:[#allocation76_spill] sm:$0xff] %v3213_v34  ;;  %v3216_v46 = vadd.f32 %v376_v41, %v3186_v25  ;;  %v765_v49 = vadd.f32 1.0, %v2311_v15  ;;  %2312 = vrcp.f32 %v764_v38 }
 0x184   :  { %4064 = vst [vmem:[#allocation77_spill] sm:$0xff] %v3216_v46  ;;  %2314 = vrcp.f32 %v765_v49  ;;  %v4086_v46 = vld [vmem:[#allocation51_spill] sm:$0xff] }
 0x185   :  { %v380_v45 = vpop.f32.mrf.mxu0 }
 0x186   :  { %v3223_v19 = vadd.f32 %v380_v45, %v3179_v23 }
 0x187   :  { %v382_v41 = vpop.f32.mrf.mxu0 }
 0x188   :  { %4065 = vst [vmem:[#allocation78_spill] sm:$0xff] %v3223_v19  ;;  %v3226_v26 = vadd.f32 %v382_v41, %v3186_v25  ;;  %v4070_v41 = vld [vmem:[#allocation27_spill] sm:$0xff]  ;;  %v4085_v19 = vld [vmem:[#allocation40_spill] sm:$0xff] }
 0x18a   :  { %4066 = vst [vmem:[#allocation79_spill] sm:$0xff] %v3226_v26  ;;  %v4084_v26 = vld [vmem:[#allocation50_spill] sm:$0xff] }
 0x18b   :  { %v386_v44 = vpop.f32.mrf.mxu0 }
 0x18c   :  { %v3229_v24 = vadd.f32 %v386_v44, %v3179_v23  ;;  %v4071_v44 = vld [vmem:[#allocation28_spill] sm:$0xff] }
 0x18d   :  { %v746_v17 = vpop.f32.mrf.mxu1 }
 0x18e   :  { %v753_v42 = vadd.f32 %v746_v17, %v458_v43  ;;  %4067 = vst [vmem:[#allocation80_spill] sm:$0xff] %v3229_v24  ;;  %v601_v17 = vld [vmem:[#allocation9] sm:$0xff]  ;;  %v4082_v24 = vld [vmem:[#allocation49_spill] sm:$0xff] }
 0x18f   :  { %v748_v31 = vpop.f32.mrf.mxu1  ;;  %v2313_v55 = vpop.eup %2312 }
 0x190   :  { %v2272_v21 = vmul.f32 -1.442695, %v753_v42  ;;  %v754_v34 = vadd.f32 %v748_v31, %v460_v50 }
 0x191   :  { %v2315_v47 = vpop.eup %2314 }
 0x192   :  { %2316 = vpow2.f32 %v2272_v21  ;;  %v774_v15 = vmul.f32 %v2315_v47, %v601_v17  ;;  %v4069_v21 = vld [vmem:[#allocation26_spill] sm:$0xff]  ;;  %v4074_v17 = vld [vmem:[#allocation31_spill] sm:$0xff] }
 0x193   :  { %2318 = vtanh.f32 %v754_v34  ;;  %v4073_v47 = vld [vmem:[#allocation30_spill] sm:$0xff] }
 0x19f   :  { %v2317_v38 = vpop.eup %2316 }
 0x1a0   :  { %v2319_v42 = vpop.eup %2318  ;;  %v766_v31 = vadd.f32 1.0, %v2317_v38  ;;  %v4075_v38 = vld [vmem:[#allocation32_spill] sm:$0xff] }
 0x1a1   :  { %v775_v45 = vmul.f32 %v2319_v42, %v2313_v55  ;;  %v4072_v55 = vld [vmem:[#allocation29_spill] sm:$0xff]  ;;  %v4076_v42 = vld [vmem:[#allocation46_spill] sm:$0xff] }
 0x1a2   :  { %2320 = vrcp.f32 %v766_v31  ;;  %v4077_v31 = vld [vmem:[#allocation36_spill] sm:$0xff] }
 0x1a3   :  { %v3231_v43 = vadd.f32 %v775_v45, %v774_v15  ;;  %v4078_v15 = vld [vmem:[#allocation47_spill] sm:$0xff]  ;;  %v4079_v45 = vld [vmem:[#allocation37_spill] sm:$0xff] }
 0x1a5   :  { %2322 = vtanh.f32 %v3231_v43 }
 0x1af   :  { %v2321_v49 = vpop.eup %2320 }
 0x1b2   :  { %v2323_v50 = vpop.eup %2322 }
 0x1b3   :  { %v3234_v34 = vmul.f32 %v2323_v50, %v2321_v49  ;;  %v4080_v49 = vld [vmem:[#allocation48_spill] sm:$0xff]  ;;  %v4081_v50 = vld [vmem:[#allocation38_spill] sm:$0xff] }
 0x1b5   :  { %4068 = vst [vmem:[#allocation81_spill] sm:$0xff] %v3234_v34  ;;  %852 = vmatmul.mubr.f32.vlgmr.msra.gmra.mxu0 %v3234_v34  ;;  %923 = vmatmul.mubr.f32.vlgmr.msra.gmra.mxu1 %v3234_v34  ;;  %v4083_v34 = vld [vmem:[#allocation39_spill] sm:$0xff] }
 0x1b6   :  { %967 = vmatpush1.msra.mxu0 %v2798_v56  ;;  %1038 = vmatpush1.msra.mxu1 %v2942_v51 }
 0x1b7   :  { %968 = vmatprep.subr.mxu0 %v2802_v58  ;;  %1039 = vmatprep.subr.mxu1 %v2946_v52 }
 0x1b8   :  { %969 = vmatpush1.msra.mxu0 %v2806_v60  ;;  %1040 = vmatpush1.msra.mxu1 %v2951_v53 }
 0x1b9   :  { %970 = vmatprep.subr.mxu0 %v2812_v63  ;;  %1041 = vmatprep.subr.mxu1 %v2954_v54 }
 0x1ba   :  { %971 = vmatpush1.msra.mxu0 %v2815_v0  ;;  %1042 = vmatpush1.msra.mxu1 %v2958_v59 }
 0x1bb   :  { %972 = vmatprep.subr.mxu0 %v2820_v2  ;;  %1043 = vmatprep.subr.mxu1 %v2962_v57 }
 0x1bc   :  { %973 = vmatpush1.msra.mxu0 %v2824_v4  ;;  %1044 = vmatpush1.msra.mxu1 %v2966_v61 }
 0x1bd   :  { %974 = vmatprep.subr.mxu0 %v2830_v7  ;;  %1045 = vmatprep.subr.mxu1 %v2970_v3 }
 0x1be   :  { %975 = vmatpush1.msra.mxu0 %v2833_v8  ;;  %1046 = vmatpush1.msra.mxu1 %v2974_v5 }
 0x1bf   :  { %976 = vmatprep.subr.mxu0 %v2838_v10  ;;  %1047 = vmatprep.subr.mxu1 %v2978_v62 }
 0x1c0   :  { %977 = vmatpush1.msra.mxu0 %v4069_v21  ;;  %1048 = vmatpush1.msra.mxu1 %v2982_v11 }
 0x1c1   :  { %978 = vmatprep.subr.mxu0 %v4070_v41  ;;  %1049 = vmatprep.subr.mxu1 %v2986_v13 }
 0x1c2   :  { %979 = vmatpush1.msra.mxu0 %v4071_v44  ;;  %1050 = vmatpush1.msra.mxu1 %v2990_v20 }
 0x1c3   :  { %980 = vmatprep.subr.mxu0 %v4072_v55  ;;  %1051 = vmatprep.subr.mxu1 %v2994_v1 }
 0x1c4   :  { %981 = vmatpush1.msra.mxu0 %v4073_v47  ;;  %1052 = vmatpush1.msra.mxu1 %v2998_v22 }
 0x1c5   :  { %982 = vmatprep.subr.mxu0 %v4074_v17  ;;  %1053 = vmatprep.subr.mxu1 %v3002_v6 }
 0x1c6   :  { %983 = vmatpush1.msra.mxu0 %v4075_v38  ;;  %1054 = vmatpush1.msra.mxu1 %v3006_v28 }
 0x1c7   :  { %984 = vmatprep.subr.mxu0 %v2874_v27  ;;  %1055 = vmatprep.subr.mxu1 %v3010_v30 }
 0x1c8   :  { %985 = vmatpush1.msra.mxu0 %v2878_v29  ;;  %1056 = vmatpush1.msra.mxu1 %v3014_v36 }
 0x1c9   :  { %986 = vmatprep.subr.mxu0 %v2884_v32  ;;  %1057 = vmatprep.subr.mxu1 %v3018_v9 }
 0x1ca   :  { %987 = vmatpush1.msra.mxu0 %v2887_v33  ;;  %1058 = vmatpush1.msra.mxu1 %v3022_v48 }
 0x1cb   :  { %988 = vmatprep.subr.mxu0 %v2892_v35  ;;  %1059 = vmatprep.subr.mxu1 %v3026_v14 }
 0x1cc   :  { %989 = vmatpush1.msra.mxu0 %v2896_v37  ;;  %1060 = vmatpush1.msra.mxu1 %v3030_v12 }
 0x1cd   :  { %990 = vmatprep.subr.mxu0 %v2902_v39  ;;  %1061 = vmatprep.subr.mxu1 %v3034_v16 }
 0x1ce   :  { %991 = vmatpush1.msra.mxu0 %v2905_v40  ;;  %1062 = vmatpush1.msra.mxu1 %v4076_v42  ;;  %v4087_v42 = vld [vmem:[#allocation41_spill] sm:$0xff] }
 0x1cf   :  { %992 = vmatprep.subr.mxu0 %v4077_v31  ;;  %1063 = vmatprep.subr.mxu1 %v4078_v15  ;;  %v4088_v31 = vmov 0.0   ;;  %v4089_v15 = vld [vmem:[#allocation52_spill] sm:$0xff] }
 0x1d0   :  { %993 = vmatpush1.msra.mxu0 %v4079_v45  ;;  %1064 = vmatpush1.msra.mxu1 %v4080_v49  ;;  %v4090_v49 = vld [vmem:[#allocation25_spill] sm:$0xff] }
 0x1d1   :  { %994 = vmatprep.subr.mxu0 %v4081_v50  ;;  %1065 = vmatprep.subr.mxu1 %v4082_v24  ;;  %v4091_v50 = vld [vmem:[#allocation42_spill] sm:$0xff]  ;;  %v3304_v24 = vpop.f32.mrf.mxu0 }
 0x1d2   :  { %995 = vmatpush1.msra.mxu0 %v4083_v34  ;;  %1066 = vmatpush1.msra.mxu1 %v4084_v26  ;;  %4092 = vst [vmem:[#allocation26_spill] sm:$0xff] %v3304_v24  ;;  %v4093_v26 = vld [vmem:[#allocation69_spill] sm:$0xff]  ;;  %v4095_v24 = vld [vmem:[#allocation55_spill] sm:$0xff] }
 0x1d3   :  { %996 = vmatprep.subr.mxu0 %v4085_v19  ;;  %1067 = vmatprep.subr.mxu1 %v4086_v46  ;;  %v351_v34 = vadd.f32 %v4093_v26, %v3179_v23  ;;  %v353_v46 = vadd.f32 %v3192_v18, %v3186_v25  ;;  %v3643_v25 = vld [vmem:[#allocation12 + $0x58] sm:$0xff] }
 0x1d4   :  { %997 = vmatpush1.msra.mxu0 %v4087_v42  ;;  %1030 = vmatprep.mubr.f32.mxu0 %v4088_v31 }
 0x1d5   :  { %1068 = vmatpush1.msra.mxu1 %v4089_v15  ;;  %1101 = vmatprep.mubr.f32.mxu1 %v4088_v31 }
 0x1d6   :  { %1145 = vmatprep.subr.mxu0 %v4090_v49  ;;  %1216 = vmatprep.subr.mxu1 %v4091_v50  ;;  %v4094_v49 = vld [vmem:[#allocation54_spill] sm:$0xff] }
 0x275   :  { %v853_v19 = vpop.f32.mrf.mxu0  ;;  %v924_v31 = vpop.f32.mrf.mxu1 }
 0x276   :  { %v929_v42 = vadd.f32 %v853_v19, %v351_v34  ;;  %v931_v39 = vadd.f32 %v924_v31, %v4094_v49  ;;  %v4120_v49 = vld [vmem:[#allocation71_spill] sm:$0xff] }
 0x277   :  { %v855_v45 = vpop.f32.mrf.mxu0  ;;  %v926_v50 = vpop.f32.mrf.mxu1 }
 0x278   :  { %v2273_v40 = vmul.f32 -1.442695, %v929_v42  ;;  %v930_v16 = vadd.f32 %v855_v45, %v353_v46  ;;  %v2275_v12 = vmul.f32 -1.442695, %v931_v39  ;;  %v932_v37 = vadd.f32 %v926_v50, %v4095_v24  ;;  %v4113_v24 = vld [vmem:[#allocation51_spill] sm:$0xff] }
 0x27a   :  { %2324 = vpow2.f32 %v2273_v40  ;;  %v2274_v15 = vmul.f32 -1.442695, %v930_v16 }
 0x27c   :  { %2326 = vpow2.f32 %v2274_v15 }
 0x27d   :  { %2328 = vpow2.f32 %v2275_v12 }
 0x27e   :  { %2330 = vtanh.f32 %v932_v37  ;;  %v4112_v37 = vld [vmem:[#allocation40_spill] sm:$0xff] }
 0x287   :  { %v2325_v14 = vpop.eup %2324 }
 0x288   :  { %v942_v23 = vadd.f32 1.0, %v2325_v14 }
 0x289   :  { %v2327_v26 = vpop.eup %2326 }
 0x28a   :  { %2332 = vrcp.f32 %v942_v23  ;;  %v943_v18 = vadd.f32 1.0, %v2327_v26  ;;  %v2329_v19 = vpop.eup %2328 }
 0x28b   :  { %v2331_v46 = vpop.eup %2330  ;;  %v944_v42 = vadd.f32 1.0, %v2329_v19  ;;  %v4121_v19 = vld [vmem:[#allocation56_spill] sm:$0xff] }
 0x28c   :  { %2334 = vrcp.f32 %v943_v18 }
 0x28d   :  { %2336 = vrcp.f32 %v944_v42 }
 0x297   :  { %v2333_v40 = vpop.eup %2332 }
 0x298   :  { %v953_v16 = vmul.f32 %v2333_v40, %v2331_v46 }
 0x299   :  { %v2335_v34 = vpop.eup %2334 }
 0x29a   :  { %v952_v31 = vmul.f32 %v2335_v34, %v3231_v43  ;;  %v2337_v39 = vpop.eup %2336  ;;  %v4114_v43 = vld [vmem:[#allocation41_spill] sm:$0xff] }
 0x29b   :  { %v4122_v34 = vld [vmem:[#allocation57_spill] sm:$0xff] }
 0x29c   :  { %v3313_v15 = vadd.f32 %v953_v16, %v952_v31 }
 0x29e   :  { %2338 = vtanh.f32 %v3313_v15 }
 0x2ab   :  { %v2339_v12 = vpop.eup %2338 }
 0x2ac   :  { %v3316_v14 = vmul.f32 %v2339_v12, %v2337_v39 }
 0x2ae   :  { %4096 = vst [vmem:[#allocation27_spill] sm:$0xff] %v3316_v14  ;;  %1031 = vmatmul.mubr.f32.vlgmr.msra.gmra.mxu0 %v3316_v14  ;;  %1102 = vmatmul.mubr.f32.vlgmr.msra.gmra.mxu1 %v3316_v14  ;;  %v3655_v14 = vld [vmem:[#allocation12 + $0x30] sm:$0xff] }
 0x2af   :  { %1146 = vmatpush1.msra.mxu0 %v2798_v56  ;;  %1217 = vmatpush1.msra.mxu1 %v2942_v51  ;;  %v4097_v56 = vld [vmem:[#allocation43_spill] sm:$0xff] }
 0x2b0   :  { %1147 = vmatprep.subr.mxu0 %v2802_v58  ;;  %1218 = vmatprep.subr.mxu1 %v2946_v52  ;;  %v4098_v58 = vld [vmem:[#allocation33_spill] sm:$0xff] }
 0x2b1   :  { %1148 = vmatpush1.msra.mxu0 %v2806_v60  ;;  %1219 = vmatpush1.msra.mxu1 %v2951_v53  ;;  %v4099_v60 = vld [vmem:[#allocation44_spill] sm:$0xff] }
 0x2b2   :  { %1149 = vmatprep.subr.mxu0 %v2812_v63  ;;  %1220 = vmatprep.subr.mxu1 %v2954_v54  ;;  %v4100_v63 = vld [vmem:[#allocation34_spill] sm:$0xff] }
 0x2b3   :  { %1150 = vmatpush1.msra.mxu0 %v2815_v0  ;;  %1221 = vmatpush1.msra.mxu1 %v2958_v59  ;;  %v4101_v0 = vld [vmem:[#allocation45_spill] sm:$0xff] }
 0x2b4   :  { %1151 = vmatprep.subr.mxu0 %v2820_v2  ;;  %1222 = vmatprep.subr.mxu1 %v2962_v57  ;;  %v4102_v2 = vld [vmem:[#allocation35_spill] sm:$0xff] }
 0x2b5   :  { %1152 = vmatpush1.msra.mxu0 %v2824_v4  ;;  %1223 = vmatpush1.msra.mxu1 %v2966_v61  ;;  %v4103_v4 = vld [vmem:[#allocation46_spill] sm:$0xff] }
 0x2b6   :  { %1153 = vmatprep.subr.mxu0 %v2830_v7  ;;  %1224 = vmatprep.subr.mxu1 %v2970_v3  ;;  %v4104_v7 = vld [vmem:[#allocation36_spill] sm:$0xff]  ;;  %4141 = vst [vmem:[#allocation46_spill] sm:$0xff] %v3643_v25 }
 0x2b7   :  { %1154 = vmatpush1.msra.mxu0 %v2833_v8  ;;  %1225 = vmatpush1.msra.mxu1 %v2974_v5  ;;  %v4105_v8 = vld [vmem:[#allocation47_spill] sm:$0xff] }
 0x2b8   :  { %1155 = vmatprep.subr.mxu0 %v2838_v10  ;;  %1226 = vmatprep.subr.mxu1 %v2978_v62  ;;  %v4106_v10 = vld [vmem:[#allocation37_spill] sm:$0xff] }
 0x2b9   :  { %1156 = vmatpush1.msra.mxu0 %v4069_v21  ;;  %1227 = vmatpush1.msra.mxu1 %v2982_v11  ;;  %v4115_v21 = vmov 0.0   ;;  %4144 = vst [vmem:[#allocation37_spill] sm:$0xff] %v3655_v14 }
 0x2ba   :  { %1157 = vmatprep.subr.mxu0 %v4070_v41  ;;  %1228 = vmatprep.subr.mxu1 %v2986_v13  ;;  %v4116_v41 = vld [vmem:[#allocation52_spill] sm:$0xff] }
 0x2bb   :  { %1158 = vmatpush1.msra.mxu0 %v4071_v44  ;;  %1229 = vmatpush1.msra.mxu1 %v2990_v20  ;;  %v3384_v44 = vld [vmem:[#allocation12 + $0x1e8] sm:$0xff] }
 0x2bc   :  { %1159 = vmatprep.subr.mxu0 %v4072_v55  ;;  %1230 = vmatprep.subr.mxu1 %v2994_v1  ;;  %4117 = vst [vmem:[#allocation28_spill] sm:$0xff] %v3384_v44  ;;  %v4118_v55 = vld [vmem:[#allocation42_spill] sm:$0xff] }
 0x2bd   :  { %1160 = vmatpush1.msra.mxu0 %v4073_v47  ;;  %1231 = vmatpush1.msra.mxu1 %v2998_v22 }
 0x2be   :  { %1161 = vmatprep.subr.mxu0 %v4074_v17  ;;  %1232 = vmatprep.subr.mxu1 %v3002_v6  ;;  %v4119_v17 = vld [vmem:[#allocation70_spill] sm:$0xff] }
 0x2bf   :  { %1162 = vmatpush1.msra.mxu0 %v4075_v38  ;;  %1233 = vmatpush1.msra.mxu1 %v3006_v28 }
 0x2c0   :  { %1163 = vmatprep.subr.mxu0 %v2874_v27  ;;  %1234 = vmatprep.subr.mxu1 %v3010_v30  ;;  %v4107_v27 = vld [vmem:[#allocation48_spill] sm:$0xff] }
 0x2c1   :  { %1164 = vmatpush1.msra.mxu0 %v2878_v29  ;;  %1235 = vmatpush1.msra.mxu1 %v3014_v36  ;;  %v4108_v29 = vld [vmem:[#allocation38_spill] sm:$0xff] }
 0x2c2   :  { %1165 = vmatprep.subr.mxu0 %v2884_v32  ;;  %1236 = vmatprep.subr.mxu1 %v3018_v9  ;;  %v4109_v32 = vld [vmem:[#allocation49_spill] sm:$0xff] }
 0x2c3   :  { %1166 = vmatpush1.msra.mxu0 %v2887_v33  ;;  %1237 = vmatpush1.msra.mxu1 %v3022_v48  ;;  %v4110_v33 = vld [vmem:[#allocation39_spill] sm:$0xff] }
 0x2c4   :  { %1167 = vmatprep.subr.mxu0 %v2892_v35  ;;  %1238 = vmatprep.subr.mxu1 %v4097_v56  ;;  %v4111_v35 = vld [vmem:[#allocation50_spill] sm:$0xff] }
 0x2c5   :  { %1168 = vmatpush1.msra.mxu0 %v4098_v58  ;;  %1239 = vmatpush1.msra.mxu1 %v4099_v60 }
 0x2c6   :  { %1169 = vmatprep.subr.mxu0 %v4100_v63  ;;  %1240 = vmatprep.subr.mxu1 %v4101_v0 }
 0x2c7   :  { %1170 = vmatpush1.msra.mxu0 %v4102_v2  ;;  %1241 = vmatpush1.msra.mxu1 %v4103_v4 }
 0x2c8   :  { %1171 = vmatprep.subr.mxu0 %v4104_v7  ;;  %1242 = vmatprep.subr.mxu1 %v4105_v8 }
 0x2c9   :  { %1172 = vmatpush1.msra.mxu0 %v4106_v10  ;;  %1243 = vmatpush1.msra.mxu1 %v4107_v27 }
 0x2ca   :  { %1173 = vmatprep.subr.mxu0 %v4108_v29  ;;  %1244 = vmatprep.subr.mxu1 %v4109_v32 }
 0x2cb   :  { %1174 = vmatpush1.msra.mxu0 %v4110_v33  ;;  %1245 = vmatpush1.msra.mxu1 %v4111_v35 }
 0x2cc   :  { %1175 = vmatprep.subr.mxu0 %v4112_v37  ;;  %1246 = vmatprep.subr.mxu1 %v4113_v24 }
 0x2cd   :  { %1176 = vmatpush1.msra.mxu0 %v4114_v43  ;;  %1209 = vmatprep.mubr.f32.mxu0 %v4115_v21 }
 0x2ce   :  { %1247 = vmatpush1.msra.mxu1 %v4116_v41  ;;  %1280 = vmatprep.mubr.f32.mxu1 %v4115_v21 }
 0x2cf   :  { %1324 = vmatprep.subr.mxu0 %v3384_v44  ;;  %1395 = vmatprep.subr.mxu1 %v4118_v55 }
 0x36e   :  { %v1032_v47 = vpop.f32.mrf.mxu0  ;;  %v1103_v18 = vpop.f32.mrf.mxu1 }
 0x36f   :  { %v1108_v38 = vadd.f32 %v1032_v47, %v4119_v17  ;;  %v1110_v46 = vadd.f32 %v1103_v18, %v4121_v19  ;;  %v4134_v18 = vld [vmem:[#allocation73_spill] sm:$0xff] }
 0x370   :  { %v1034_v45 = vpop.f32.mrf.mxu0  ;;  %v1105_v40 = vpop.f32.mrf.mxu1 }
 0x371   :  { %v2276_v50 = vmul.f32 -1.442695, %v1108_v38  ;;  %v1109_v23 = vadd.f32 %v1034_v45, %v4120_v49  ;;  %v2278_v16 = vmul.f32 -1.442695, %v1110_v46  ;;  %v1111_v42 = vadd.f32 %v1105_v40, %v4122_v34  ;;  %v3400_v38 = vld [vmem:[#allocation12 + $0x1e0] sm:$0xff] }
 0x372   :  { %v3408_v45 = vld [vmem:[#allocation12 + $0x1c0] sm:$0xff] }
 0x373   :  { %2340 = vpow2.f32 %v2276_v50  ;;  %v2277_v26 = vmul.f32 -1.442695, %v1109_v23  ;;  %v3412_v50 = vld [vmem:[#allocation12 + $0x1a8] sm:$0xff]  ;;  %v3416_v49 = vld [vmem:[#allocation12 + $0x1a0] sm:$0xff] }
 0x375   :  { %2342 = vpow2.f32 %v2277_v26 }
 0x376   :  { %2344 = vpow2.f32 %v2278_v16 }
 0x377   :  { %2346 = vtanh.f32 %v1111_v42 }
 0x380   :  { %v2341_v31 = vpop.eup %2340 }
 0x381   :  { %v1121_v39 = vadd.f32 1.0, %v2341_v31  ;;  %v4136_v31 = vld [vmem:[#allocation59_spill] sm:$0xff] }
 0x382   :  { %v2343_v12 = vpop.eup %2342 }
 0x383   :  { %2348 = vrcp.f32 %v1121_v39  ;;  %v1122_v58 = vadd.f32 1.0, %v2343_v12  ;;  %v2345_v63 = vpop.eup %2344 }
 0x384   :  { %v2347_v2 = vpop.eup %2346  ;;  %v1123_v33 = vadd.f32 1.0, %v2345_v63 }
 0x385   :  { %2350 = vrcp.f32 %v1122_v58 }
 0x386   :  { %2352 = vrcp.f32 %v1123_v33 }
 0x390   :  { %v2349_v7 = vpop.eup %2348 }
 0x391   :  { %v1132_v10 = vmul.f32 %v2349_v7, %v2347_v2 }
 0x392   :  { %v2351_v29 = vpop.eup %2350 }
 0x393   :  { %v1131_v37 = vmul.f32 %v2351_v29, %v3313_v15  ;;  %v2353_v55 = vpop.eup %2352  ;;  %v3404_v15 = vld [vmem:[#allocation12 + $0x1c8] sm:$0xff] }
 0x395   :  { %v3393_v43 = vadd.f32 %v1132_v10, %v1131_v37 }
 0x397   :  { %2354 = vtanh.f32 %v3393_v43 }
 0x3a4   :  { %v2355_v47 = vpop.eup %2354 }
 0x3a5   :  { %v3396_v17 = vmul.f32 %v2355_v47, %v2353_v55 }
 0x3a7   :  { %4123 = vst [vmem:[#allocation29_spill] sm:$0xff] %v3396_v17  ;;  %1210 = vmatmul.mubr.f32.vlgmr.msra.gmra.mxu0 %v3396_v17  ;;  %1281 = vmatmul.mubr.f32.vlgmr.msra.gmra.mxu1 %v3396_v17  ;;  %v3651_v17 = vld [vmem:[#allocation12 + $0x38] sm:$0xff] }
 0x3a8   :  { %1325 = vmatpush1.msra.mxu0 %v3400_v38  ;;  %1396 = vmatpush1.msra.mxu1 %v2942_v51  ;;  %v3420_v51 = vld [vmem:[#allocation12 + $0x188] sm:$0xff]  ;;  %4143 = vst [vmem:[#allocation47_spill] sm:$0xff] %v3651_v17 }
 0x3a9   :  { %1326 = vmatprep.subr.mxu0 %v3404_v15  ;;  %1397 = vmatprep.subr.mxu1 %v2946_v52  ;;  %v3424_v52 = vld [vmem:[#allocation12 + $0x180] sm:$0xff] }
 0x3aa   :  { %1327 = vmatpush1.msra.mxu0 %v3408_v45  ;;  %1398 = vmatpush1.msra.mxu1 %v2951_v53  ;;  %v3428_v53 = vld [vmem:[#allocation12 + $0x168] sm:$0xff] }
 0x3ab   :  { %1328 = vmatprep.subr.mxu0 %v3412_v50  ;;  %1399 = vmatprep.subr.mxu1 %v2954_v54  ;;  %v3432_v54 = vld [vmem:[#allocation12 + $0x160] sm:$0xff] }
 0x3ac   :  { %1329 = vmatpush1.msra.mxu0 %v3416_v49  ;;  %1400 = vmatpush1.msra.mxu1 %v2958_v59  ;;  %v3436_v59 = vld [vmem:[#allocation12 + $0x148] sm:$0xff] }
 0x3ad   :  { %1330 = vmatprep.subr.mxu0 %v3420_v51  ;;  %1401 = vmatprep.subr.mxu1 %v2962_v57  ;;  %v3440_v57 = vld [vmem:[#allocation12 + $0x140] sm:$0xff] }
 0x3ae   :  { %1331 = vmatpush1.msra.mxu0 %v3424_v52  ;;  %1402 = vmatpush1.msra.mxu1 %v2966_v61  ;;  %v3444_v61 = vld [vmem:[#allocation12 + $0x128] sm:$0xff] }
 0x3af   :  { %1332 = vmatprep.subr.mxu0 %v3428_v53  ;;  %1403 = vmatprep.subr.mxu1 %v2970_v3  ;;  %v3448_v3 = vld [vmem:[#allocation12 + $0x120] sm:$0xff] }
 0x3b0   :  { %1333 = vmatpush1.msra.mxu0 %v3432_v54  ;;  %1404 = vmatpush1.msra.mxu1 %v2974_v5  ;;  %v3452_v5 = vld [vmem:[#allocation12 + $0x108] sm:$0xff] }
 0x3b1   :  { %1334 = vmatprep.subr.mxu0 %v3436_v59  ;;  %1405 = vmatprep.subr.mxu1 %v2978_v62  ;;  %v3456_v62 = vld [vmem:[#allocation12 + $0x100] sm:$0xff] }
 0x3b2   :  { %1335 = vmatpush1.msra.mxu0 %v3440_v57  ;;  %1406 = vmatpush1.msra.mxu1 %v2982_v11  ;;  %v3460_v11 = vld [vmem:[#allocation12 + $0xe8] sm:$0xff] }
 0x3b3   :  { %1336 = vmatprep.subr.mxu0 %v3444_v61  ;;  %1407 = vmatprep.subr.mxu1 %v2986_v13  ;;  %v3464_v13 = vld [vmem:[#allocation12 + $0xe0] sm:$0xff] }
 0x3b4   :  { %1337 = vmatpush1.msra.mxu0 %v3448_v3  ;;  %1408 = vmatpush1.msra.mxu1 %v2990_v20  ;;  %v3468_v20 = vld [vmem:[#allocation12 + $0xc8] sm:$0xff] }
 0x3b5   :  { %1338 = vmatprep.subr.mxu0 %v3452_v5  ;;  %1409 = vmatprep.subr.mxu1 %v2994_v1  ;;  %v3472_v1 = vld [vmem:[#allocation12 + $0xc0] sm:$0xff] }
 0x3b6   :  { %1339 = vmatpush1.msra.mxu0 %v3456_v62  ;;  %1410 = vmatpush1.msra.mxu1 %v2998_v22  ;;  %v3476_v22 = vld [vmem:[#allocation12 + $0xa8] sm:$0xff] }
 0x3b7   :  { %1340 = vmatprep.subr.mxu0 %v3460_v11  ;;  %1411 = vmatprep.subr.mxu1 %v3002_v6  ;;  %v3480_v6 = vld [vmem:[#allocation12 + $0xa0] sm:$0xff] }
 0x3b8   :  { %1341 = vmatpush1.msra.mxu0 %v3464_v13  ;;  %1412 = vmatpush1.msra.mxu1 %v3006_v28  ;;  %v3484_v28 = vld [vmem:[#allocation12 + $0x88] sm:$0xff] }
 0x3b9   :  { %1342 = vmatprep.subr.mxu0 %v3468_v20  ;;  %1413 = vmatprep.subr.mxu1 %v3010_v30  ;;  %v3488_v30 = vld [vmem:[#allocation12 + $0x80] sm:$0xff] }
 0x3ba   :  { %1343 = vmatpush1.msra.mxu0 %v3472_v1  ;;  %1414 = vmatpush1.msra.mxu1 %v3014_v36  ;;  %v3492_v36 = vld [vmem:[#allocation12 + $0x68] sm:$0xff] }
 0x3bb   :  { %1344 = vmatprep.subr.mxu0 %v3476_v22  ;;  %1415 = vmatprep.subr.mxu1 %v3018_v9  ;;  %4124 = vst [vmem:[#allocation30_spill] sm:$0xff] %v3492_v36  ;;  %v3496_v9 = vld [vmem:[#allocation12 + $0x60] sm:$0xff] }
 0x3bc   :  { %1345 = vmatpush1.msra.mxu0 %v3480_v6  ;;  %1416 = vmatpush1.msra.mxu1 %v3022_v48  ;;  %4125 = vst [vmem:[#allocation31_spill] sm:$0xff] %v3496_v9  ;;  %v3500_v48 = vld [vmem:[#allocation12 + $0x48] sm:$0xff] }
 0x3bd   :  { %1346 = vmatprep.subr.mxu0 %v3484_v28  ;;  %1417 = vmatprep.subr.mxu1 %v4097_v56  ;;  %4126 = vst [vmem:[#allocation32_spill] sm:$0xff] %v3500_v48  ;;  %v3504_v56 = vld [vmem:[#allocation12 + $0x40] sm:$0xff] }
 0x3be   :  { %1347 = vmatpush1.msra.mxu0 %v3488_v30  ;;  %1418 = vmatpush1.msra.mxu1 %v4099_v60  ;;  %4127 = vst [vmem:[#allocation25_spill] sm:$0xff] %v3504_v56  ;;  %v3508_v60 = vld [vmem:[#allocation12 + $0x28] sm:$0xff] }
 0x3bf   :  { %1348 = vmatprep.subr.mxu0 %v3492_v36  ;;  %1419 = vmatprep.subr.mxu1 %v4101_v0  ;;  %4128 = vst [vmem:[#allocation69_spill] sm:$0xff] %v3508_v60  ;;  %v3512_v0 = vld [vmem:[#allocation12 + $0x20] sm:$0xff] }
 0x3c0   :  { %1349 = vmatpush1.msra.mxu0 %v3496_v9  ;;  %1420 = vmatpush1.msra.mxu1 %v4103_v4  ;;  %4129 = vst [vmem:[#allocation54_spill] sm:$0xff] %v3512_v0  ;;  %v3516_v4 = vld [vmem:[#allocation12 + $0x8] sm:$0xff] }
 0x3c1   :  { %1350 = vmatprep.subr.mxu0 %v3500_v48  ;;  %1421 = vmatprep.subr.mxu1 %v4105_v8  ;;  %4130 = vst [vmem:[#allocation55_spill] sm:$0xff] %v3516_v4  ;;  %v3520_v8 = vld [vmem:[#allocation12] sm:$0xff] }
 0x3c2   :  { %1351 = vmatpush1.msra.mxu0 %v3504_v56  ;;  %1422 = vmatpush1.msra.mxu1 %v4107_v27  ;;  %4131 = vst [vmem:[#allocation43_spill] sm:$0xff] %v3520_v8  ;;  %v3527_v27 = vld [vmem:[#allocation12 + $0x1f8] sm:$0xff] }
 0x3c3   :  { %1352 = vmatprep.subr.mxu0 %v3508_v60  ;;  %1423 = vmatprep.subr.mxu1 %v4109_v32  ;;  %4132 = vst [vmem:[#allocation33_spill] sm:$0xff] %v3527_v27 }
 0x3c4   :  { %1353 = vmatpush1.msra.mxu0 %v3512_v0  ;;  %1424 = vmatpush1.msra.mxu1 %v4111_v35  ;;  %v4133_v35 = vld [vmem:[#allocation72_spill] sm:$0xff] }
 0x3c5   :  { %1354 = vmatprep.subr.mxu0 %v3516_v4  ;;  %1425 = vmatprep.subr.mxu1 %v4113_v24 }
 0x3c6   :  { %1355 = vmatpush1.msra.mxu0 %v3520_v8  ;;  %1388 = vmatprep.mubr.f32.mxu0 %v4115_v21 }
 0x3c7   :  { %1426 = vmatpush1.msra.mxu1 %v4116_v41  ;;  %1459 = vmatprep.mubr.f32.mxu1 %v4115_v21  ;;  %v4135_v41 = vld [vmem:[#allocation58_spill] sm:$0xff] }
 0x3c8   :  { %1503 = vmatprep.subr.mxu0 %v3384_v44  ;;  %1574 = vmatprep.subr.mxu1 %v3527_v27 }
 0x467   :  { %v1211_v32 = vpop.f32.mrf.mxu0  ;;  %v1282_v40 = vpop.f32.mrf.mxu1 }
 0x468   :  { %v1287_v23 = vadd.f32 %v1211_v32, %v4133_v35  ;;  %v1289_v16 = vadd.f32 %v1282_v40, %v4135_v41  ;;  %v3563_v40 = vld [vmem:[#allocation12 + $0x198] sm:$0xff]  ;;  %v3567_v41 = vld [vmem:[#allocation12 + $0x190] sm:$0xff] }
 0x469   :  { %v1213_v24 = vpop.f32.mrf.mxu0  ;;  %v1284_v34 = vpop.f32.mrf.mxu1 }
 0x46a   :  { %v2279_v26 = vmul.f32 -1.442695, %v1287_v23  ;;  %v1288_v19 = vadd.f32 %v1213_v24, %v4134_v18  ;;  %v2281_v42 = vmul.f32 -1.442695, %v1289_v16  ;;  %v1290_v39 = vadd.f32 %v1284_v34, %v4136_v31  ;;  %v3551_v18 = vld [vmem:[#allocation12 + $0x1d0] sm:$0xff]  ;;  %v3571_v16 = vld [vmem:[#allocation12 + $0x178] sm:$0xff] }
 0x46b   :  { %v3575_v34 = vld [vmem:[#allocation12 + $0x170] sm:$0xff] }
 0x46c   :  { %2356 = vpow2.f32 %v2279_v26  ;;  %v2280_v46 = vmul.f32 -1.442695, %v1288_v19  ;;  %v3543_v26 = vld [vmem:[#allocation12 + $0x1f0] sm:$0xff]  ;;  %v3555_v19 = vld [vmem:[#allocation12 + $0x1b8] sm:$0xff] }
 0x46d   :  { %v3583_v31 = vld [vmem:[#allocation12 + $0x150] sm:$0xff] }
 0x46e   :  { %2358 = vpow2.f32 %v2280_v46  ;;  %v3559_v46 = vld [vmem:[#allocation12 + $0x1b0] sm:$0xff] }
 0x46f   :  { %2360 = vpow2.f32 %v2281_v42  ;;  %v3579_v42 = vld [vmem:[#allocation12 + $0x158] sm:$0xff] }
 0x470   :  { %2362 = vtanh.f32 %v1290_v39  ;;  %v3587_v39 = vld [vmem:[#allocation12 + $0x138] sm:$0xff] }
 0x479   :  { %v2357_v12 = vpop.eup %2356 }
 0x47a   :  { %v1300_v58 = vadd.f32 1.0, %v2357_v12  ;;  %v3591_v12 = vld [vmem:[#allocation12 + $0x130] sm:$0xff] }
 0x47b   :  { %v2359_v63 = vpop.eup %2358 }
 0x47c   :  { %2364 = vrcp.f32 %v1300_v58  ;;  %v1301_v2 = vadd.f32 1.0, %v2359_v63  ;;  %v2361_v7 = vpop.eup %2360  ;;  %v3595_v58 = vld [vmem:[#allocation12 + $0x118] sm:$0xff]  ;;  %v3599_v63 = vld [vmem:[#allocation12 + $0x110] sm:$0xff] }
 0x47d   :  { %v2363_v10 = vpop.eup %2362  ;;  %v1302_v55 = vadd.f32 1.0, %v2361_v7  ;;  %v3607_v7 = vld [vmem:[#allocation12 + $0xf0] sm:$0xff] }
 0x47e   :  { %2366 = vrcp.f32 %v1301_v2  ;;  %v3603_v2 = vld [vmem:[#allocation12 + $0xf8] sm:$0xff] }
 0x47f   :  { %2368 = vrcp.f32 %v1302_v55  ;;  %v3627_v55 = vld [vmem:[#allocation12 + $0x98] sm:$0xff] }
 0x489   :  { %v2365_v29 = vpop.eup %2364 }
 0x48a   :  { %v1311_v33 = vmul.f32 %v2365_v29, %v2363_v10  ;;  %v3611_v10 = vld [vmem:[#allocation12 + $0xd8] sm:$0xff]  ;;  %v3615_v29 = vld [vmem:[#allocation12 + $0xd0] sm:$0xff] }
 0x48b   :  { %v2367_v37 = vpop.eup %2366 }
 0x48c   :  { %v1310_v47 = vmul.f32 %v2367_v37, %v3393_v43  ;;  %v2369_v35 = vpop.eup %2368  ;;  %v3547_v43 = vld [vmem:[#allocation12 + $0x1d8] sm:$0xff]  ;;  %v3623_v37 = vld [vmem:[#allocation12 + $0xb0] sm:$0xff] }
 0x48e   :  { %v3535_v32 = vadd.f32 %v1311_v33, %v1310_v47  ;;  %v3619_v33 = vld [vmem:[#allocation12 + $0xb8] sm:$0xff]  ;;  %v3631_v47 = vld [vmem:[#allocation12 + $0x90] sm:$0xff] }
 0x48f   :  { %4138 = vst [vmem:[#allocation34_spill] sm:$0xff] %v3631_v47 }
 0x490   :  { %2370 = vtanh.f32 %v3535_v32 }
 0x49d   :  { %v2371_v23 = vpop.eup %2370 }
 0x49e   :  { %v3538_v24 = vmul.f32 %v2371_v23, %v2369_v35  ;;  %v3635_v35 = vld [vmem:[#allocation12 + $0x78] sm:$0xff]  ;;  %v3639_v23 = vld [vmem:[#allocation12 + $0x70] sm:$0xff] }
 0x49f   :  { %4139 = vst [vmem:[#allocation45_spill] sm:$0xff] %v3635_v35  ;;  %4140 = vst [vmem:[#allocation35_spill] sm:$0xff] %v3639_v23 }
 0x4a0   :  { %4137 = vst [vmem:[#allocation44_spill] sm:$0xff] %v3538_v24  ;;  %1389 = vmatmul.mubr.f32.vlgmr.msra.gmra.mxu0 %v3538_v24  ;;  %1460 = vmatmul.mubr.f32.vlgmr.msra.gmra.mxu1 %v3538_v24  ;;  %v3647_v24 = vld [vmem:[#allocation12 + $0x50] sm:$0xff] }
 0x4a1   :  { %1504 = vmatpush1.msra.mxu0 %v3400_v38  ;;  %1575 = vmatpush1.msra.mxu1 %v3543_v26  ;;  %4142 = vst [vmem:[#allocation36_spill] sm:$0xff] %v3647_v24 }
 0x4a2   :  { %1505 = vmatprep.subr.mxu0 %v3404_v15  ;;  %1576 = vmatprep.subr.mxu1 %v3547_v43 }
 0x4a3   :  { %1506 = vmatpush1.msra.mxu0 %v3408_v45  ;;  %1577 = vmatpush1.msra.mxu1 %v3551_v18 }
 0x4a4   :  { %1507 = vmatprep.subr.mxu0 %v3412_v50  ;;  %1578 = vmatprep.subr.mxu1 %v3555_v19 }
 0x4a5   :  { %1508 = vmatpush1.msra.mxu0 %v3416_v49  ;;  %1579 = vmatpush1.msra.mxu1 %v3559_v46 }
 0x4a6   :  { %1509 = vmatprep.subr.mxu0 %v3420_v51  ;;  %1580 = vmatprep.subr.mxu1 %v3563_v40 }
 0x4a7   :  { %1510 = vmatpush1.msra.mxu0 %v3424_v52  ;;  %1581 = vmatpush1.msra.mxu1 %v3567_v41 }
 0x4a8   :  { %1511 = vmatprep.subr.mxu0 %v3428_v53  ;;  %1582 = vmatprep.subr.mxu1 %v3571_v16 }
 0x4a9   :  { %1512 = vmatpush1.msra.mxu0 %v3432_v54  ;;  %1583 = vmatpush1.msra.mxu1 %v3575_v34 }
 0x4aa   :  { %1513 = vmatprep.subr.mxu0 %v3436_v59  ;;  %1584 = vmatprep.subr.mxu1 %v3579_v42 }
 0x4ab   :  { %1514 = vmatpush1.msra.mxu0 %v3440_v57  ;;  %1585 = vmatpush1.msra.mxu1 %v3583_v31 }
 0x4ac   :  { %1515 = vmatprep.subr.mxu0 %v3444_v61  ;;  %1586 = vmatprep.subr.mxu1 %v3587_v39 }
 0x4ad   :  { %1516 = vmatpush1.msra.mxu0 %v3448_v3  ;;  %1587 = vmatpush1.msra.mxu1 %v3591_v12 }
 0x4ae   :  { %1517 = vmatprep.subr.mxu0 %v3452_v5  ;;  %1588 = vmatprep.subr.mxu1 %v3595_v58 }
 0x4af   :  { %1518 = vmatpush1.msra.mxu0 %v3456_v62  ;;  %1589 = vmatpush1.msra.mxu1 %v3599_v63 }
 0x4b0   :  { %1519 = vmatprep.subr.mxu0 %v3460_v11  ;;  %1590 = vmatprep.subr.mxu1 %v3603_v2 }
 0x4b1   :  { %1520 = vmatpush1.msra.mxu0 %v3464_v13  ;;  %1591 = vmatpush1.msra.mxu1 %v3607_v7 }
 0x4b2   :  { %1521 = vmatprep.subr.mxu0 %v3468_v20  ;;  %1592 = vmatprep.subr.mxu1 %v3611_v10 }
 0x4b3   :  { %1522 = vmatpush1.msra.mxu0 %v3472_v1  ;;  %1593 = vmatpush1.msra.mxu1 %v3615_v29 }
 0x4b4   :  { %1523 = vmatprep.subr.mxu0 %v3476_v22  ;;  %1594 = vmatprep.subr.mxu1 %v3619_v33 }
 0x4b5   :  { %1524 = vmatpush1.msra.mxu0 %v3480_v6  ;;  %1595 = vmatpush1.msra.mxu1 %v3623_v37 }
 0x4b6   :  { %1525 = vmatprep.subr.mxu0 %v3484_v28  ;;  %1596 = vmatprep.subr.mxu1 %v3627_v55 }
 0x4b7   :  { %1526 = vmatpush1.msra.mxu0 %v3488_v30  ;;  %1597 = vmatpush1.msra.mxu1 %v3631_v47 }
 0x4b8   :  { %1527 = vmatprep.subr.mxu0 %v3492_v36  ;;  %1598 = vmatprep.subr.mxu1 %v3635_v35 }
 0x4b9   :  { %1528 = vmatpush1.msra.mxu0 %v3496_v9  ;;  %1599 = vmatpush1.msra.mxu1 %v3639_v23  ;;  %v4149_v23 = vld [vmem:[#allocation60_spill] sm:$0xff] }
 0x4ba   :  { %1529 = vmatprep.subr.mxu0 %v3500_v48  ;;  %1600 = vmatprep.subr.mxu1 %v3643_v25  ;;  %v3659_v25 = vld [vmem:[#allocation12 + $0x18] sm:$0xff] }
 0x4bb   :  { %1530 = vmatpush1.msra.mxu0 %v3504_v56  ;;  %1601 = vmatpush1.msra.mxu1 %v3647_v24  ;;  %4145 = vst [vmem:[#allocation48_spill] sm:$0xff] %v3659_v25 }
 0x4bc   :  { %1531 = vmatprep.subr.mxu0 %v3508_v60  ;;  %1602 = vmatprep.subr.mxu1 %v3651_v17  ;;  %v3664_v60 = vld [vmem:[#allocation12 + $0x10] sm:$0xff] }
 0x4bd   :  { %1532 = vmatpush1.msra.mxu0 %v3512_v0  ;;  %1603 = vmatpush1.msra.mxu1 %v3655_v14  ;;  %4146 = vst [vmem:[#allocation38_spill] sm:$0xff] %v3664_v60 }
 0x4be   :  { %1533 = vmatprep.subr.mxu0 %v3516_v4  ;;  %1604 = vmatprep.subr.mxu1 %v3659_v25  ;;  %v4147_v4 = vld [vmem:[#allocation74_spill] sm:$0xff]  ;;  %v4148_v25 = vld [vmem:[#allocation75_spill] sm:$0xff] }
 0x4bf   :  { %1534 = vmatpush1.msra.mxu0 %v3520_v8  ;;  %1567 = vmatprep.mubr.f32.mxu0 %v4115_v21 }
 0x4c0   :  { %1605 = vmatpush1.msra.mxu1 %v3664_v60  ;;  %1638 = vmatprep.mubr.f32.mxu1 %v4115_v21  ;;  %v4150_v21 = vld [vmem:[#allocation61_spill] sm:$0xff] }
 0x4c1   :  { %1682 = vmatprep.subr.mxu0 %v3384_v44  ;;  %1753 = vmatprep.subr.mxu1 %v3527_v27 }
 0x560   :  { %v1390_v14 = vpop.f32.mrf.mxu0  ;;  %v1461_v48 = vpop.f32.mrf.mxu1 }
 0x561   :  { %v1466_v0 = vadd.f32 %v1390_v14, %v4147_v4  ;;  %v1468_v9 = vadd.f32 %v1461_v48, %v4149_v23  ;;  %v4158_v23 = vld [vmem:[#allocation46_spill] sm:$0xff] }
 0x562   :  { %v1392_v17 = vpop.f32.mrf.mxu0  ;;  %v1463_v60 = vpop.f32.mrf.mxu1 }
 0x563   :  { %v2282_v24 = vmul.f32 -1.442695, %v1466_v0  ;;  %v1467_v56 = vadd.f32 %v1392_v17, %v4148_v25  ;;  %v2284_v35 = vmul.f32 -1.442695, %v1468_v9  ;;  %v1469_v36 = vadd.f32 %v1463_v60, %v4150_v21  ;;  %v4153_v60 = vld [vmem:[#allocation30_spill] sm:$0xff] }
 0x565   :  { %2372 = vpow2.f32 %v2282_v24  ;;  %v2283_v8 = vmul.f32 -1.442695, %v1467_v56 }
 0x567   :  { %2374 = vpow2.f32 %v2283_v8 }
 0x568   :  { %2376 = vpow2.f32 %v2284_v35  ;;  %v4157_v35 = vld [vmem:[#allocation32_spill] sm:$0xff] }
 0x569   :  { %2378 = vtanh.f32 %v1469_v36  ;;  %v4152_v36 = vld [vmem:[#allocation34_spill] sm:$0xff] }
 0x572   :  { %v2373_v44 = vpop.eup %2372 }
 0x573   :  { %v1479_v47 = vadd.f32 1.0, %v2373_v44 }
 0x574   :  { %v2375_v27 = vpop.eup %2374 }
 0x575   :  { %2380 = vrcp.f32 %v1479_v47  ;;  %v1480_v14 = vadd.f32 1.0, %v2375_v27  ;;  %v2377_v0 = vpop.eup %2376  ;;  %v4154_v27 = vld [vmem:[#allocation45_spill] sm:$0xff]  ;;  %v4156_v47 = vld [vmem:[#allocation35_spill] sm:$0xff] }
 0x576   :  { %v2379_v25 = vpop.eup %2378  ;;  %v1481_v8 = vadd.f32 1.0, %v2377_v0  ;;  %v4160_v0 = vld [vmem:[#allocation36_spill] sm:$0xff] }
 0x577   :  { %2382 = vrcp.f32 %v1480_v14  ;;  %v4159_v14 = vld [vmem:[#allocation25_spill] sm:$0xff] }
 0x578   :  { %2384 = vrcp.f32 %v1481_v8  ;;  %v4165_v8 = vld [vmem:[#allocation55_spill] sm:$0xff] }
 0x582   :  { %v2381_v17 = vpop.eup %2380 }
 0x583   :  { %v1490_v56 = vmul.f32 %v2381_v17, %v2379_v25  ;;  %v4161_v25 = vld [vmem:[#allocation69_spill] sm:$0xff]  ;;  %v4162_v17 = vld [vmem:[#allocation47_spill] sm:$0xff] }
 0x584   :  { %v2383_v4 = vpop.eup %2382 }
 0x585   :  { %v1489_v48 = vmul.f32 %v2383_v4, %v3535_v32  ;;  %v2385_v21 = vpop.eup %2384  ;;  %v4155_v32 = vld [vmem:[#allocation31_spill] sm:$0xff]  ;;  %v4164_v4 = vld [vmem:[#allocation37_spill] sm:$0xff] }
 0x587   :  { %v3675_v24 = vadd.f32 %v1490_v56, %v1489_v48  ;;  %v4163_v56 = vld [vmem:[#allocation54_spill] sm:$0xff]  ;;  %v4166_v48 = vld [vmem:[#allocation48_spill] sm:$0xff] }
 0x589   :  { %2386 = vtanh.f32 %v3675_v24 }
 0x596   :  { %v2387_v44 = vpop.eup %2386 }
 0x597   :  { %v3678_v9 = vmul.f32 %v2387_v44, %v2385_v21  ;;  %v4167_v21 = vld [vmem:[#allocation43_spill] sm:$0xff]  ;;  %v4168_v44 = vmov 0.0  }
 0x599   :  { %4151 = vst [vmem:[#allocation49_spill] sm:$0xff] %v3678_v9  ;;  %1568 = vmatmul.mubr.f32.vlgmr.msra.gmra.mxu0 %v3678_v9  ;;  %1639 = vmatmul.mubr.f32.vlgmr.msra.gmra.mxu1 %v3678_v9  ;;  %v4169_v9 = vld [vmem:[#allocation38_spill] sm:$0xff] }
 0x59a   :  { %1683 = vmatpush1.msra.mxu0 %v3400_v38  ;;  %1754 = vmatpush1.msra.mxu1 %v3543_v26 }
 0x59b   :  { %1684 = vmatprep.subr.mxu0 %v3404_v15  ;;  %1755 = vmatprep.subr.mxu1 %v3547_v43 }
 0x59c   :  { %1685 = vmatpush1.msra.mxu0 %v3408_v45  ;;  %1756 = vmatpush1.msra.mxu1 %v3551_v18 }
 0x59d   :  { %1686 = vmatprep.subr.mxu0 %v3412_v50  ;;  %1757 = vmatprep.subr.mxu1 %v3555_v19 }
 0x59e   :  { %1687 = vmatpush1.msra.mxu0 %v3416_v49  ;;  %1758 = vmatpush1.msra.mxu1 %v3559_v46 }
 0x59f   :  { %1688 = vmatprep.subr.mxu0 %v3420_v51  ;;  %1759 = vmatprep.subr.mxu1 %v3563_v40 }
 0x5a0   :  { %1689 = vmatpush1.msra.mxu0 %v3424_v52  ;;  %1760 = vmatpush1.msra.mxu1 %v3567_v41 }
 0x5a1   :  { %1690 = vmatprep.subr.mxu0 %v3428_v53  ;;  %1761 = vmatprep.subr.mxu1 %v3571_v16 }
 0x5a2   :  { %1691 = vmatpush1.msra.mxu0 %v3432_v54  ;;  %1762 = vmatpush1.msra.mxu1 %v3575_v34 }
 0x5a3   :  { %1692 = vmatprep.subr.mxu0 %v3436_v59  ;;  %1763 = vmatprep.subr.mxu1 %v3579_v42 }
 0x5a4   :  { %1693 = vmatpush1.msra.mxu0 %v3440_v57  ;;  %1764 = vmatpush1.msra.mxu1 %v3583_v31 }
 0x5a5   :  { %1694 = vmatprep.subr.mxu0 %v3444_v61  ;;  %1765 = vmatprep.subr.mxu1 %v3587_v39 }
 0x5a6   :  { %1695 = vmatpush1.msra.mxu0 %v3448_v3  ;;  %1766 = vmatpush1.msra.mxu1 %v3591_v12 }
 0x5a7   :  { %1696 = vmatprep.subr.mxu0 %v3452_v5  ;;  %1767 = vmatprep.subr.mxu1 %v3595_v58 }
 0x5a8   :  { %1697 = vmatpush1.msra.mxu0 %v3456_v62  ;;  %1768 = vmatpush1.msra.mxu1 %v3599_v63 }
 0x5a9   :  { %1698 = vmatprep.subr.mxu0 %v3460_v11  ;;  %1769 = vmatprep.subr.mxu1 %v3603_v2 }
 0x5aa   :  { %1699 = vmatpush1.msra.mxu0 %v3464_v13  ;;  %1770 = vmatpush1.msra.mxu1 %v3607_v7 }
 0x5ab   :  { %1700 = vmatprep.subr.mxu0 %v3468_v20  ;;  %1771 = vmatprep.subr.mxu1 %v3611_v10 }
 0x5ac   :  { %1701 = vmatpush1.msra.mxu0 %v3472_v1  ;;  %1772 = vmatpush1.msra.mxu1 %v3615_v29 }
 0x5ad   :  { %1702 = vmatprep.subr.mxu0 %v3476_v22  ;;  %1773 = vmatprep.subr.mxu1 %v3619_v33 }
 0x5ae   :  { %1703 = vmatpush1.msra.mxu0 %v3480_v6  ;;  %1774 = vmatpush1.msra.mxu1 %v3623_v37 }
 0x5af   :  { %1704 = vmatprep.subr.mxu0 %v3484_v28  ;;  %1775 = vmatprep.subr.mxu1 %v3627_v55 }
 0x5b0   :  { %1705 = vmatpush1.msra.mxu0 %v3488_v30  ;;  %1776 = vmatpush1.msra.mxu1 %v4152_v36 }
 0x5b1   :  { %1706 = vmatprep.subr.mxu0 %v4153_v60  ;;  %1777 = vmatprep.subr.mxu1 %v4154_v27 }
 0x5b2   :  { %1707 = vmatpush1.msra.mxu0 %v4155_v32  ;;  %1778 = vmatpush1.msra.mxu1 %v4156_v47  ;;  %v4174_v47 = vld [vmem:[#allocation62_spill] sm:$0xff] }
 0x5b3   :  { %1708 = vmatprep.subr.mxu0 %v4157_v35  ;;  %1779 = vmatprep.subr.mxu1 %v4158_v23 }
 0x5b4   :  { %1709 = vmatpush1.msra.mxu0 %v4159_v14  ;;  %1780 = vmatpush1.msra.mxu1 %v4160_v0  ;;  %v4170_v0 = vld [vmem:[#allocation28_spill] sm:$0xff] }
 0x5b5   :  { %1710 = vmatprep.subr.mxu0 %v4161_v25  ;;  %1781 = vmatprep.subr.mxu1 %v4162_v17  ;;  %v4171_v25 = vld [vmem:[#allocation33_spill] sm:$0xff] }
 0x5b6   :  { %1711 = vmatpush1.msra.mxu0 %v4163_v56  ;;  %1782 = vmatpush1.msra.mxu1 %v4164_v4  ;;  %v4172_v56 = vld [vmem:[#allocation76_spill] sm:$0xff] }
 0x5b7   :  { %1712 = vmatprep.subr.mxu0 %v4165_v8  ;;  %1783 = vmatprep.subr.mxu1 %v4166_v48  ;;  %v4173_v8 = vld [vmem:[#allocation77_spill] sm:$0xff] }
 0x5b8   :  { %1713 = vmatpush1.msra.mxu0 %v4167_v21  ;;  %1746 = vmatprep.mubr.f32.mxu0 %v4168_v44 }
 0x5b9   :  { %1784 = vmatpush1.msra.mxu1 %v4169_v9  ;;  %1817 = vmatprep.mubr.f32.mxu1 %v4168_v44  ;;  %v4175_v44 = vld [vmem:[#allocation63_spill] sm:$0xff] }
 0x5ba   :  { %1861 = vmatprep.subr.mxu0 %v4170_v0  ;;  %1932 = vmatprep.subr.mxu1 %v4171_v25 }
 0x659   :  { %v1569_v17 = vpop.f32.mrf.mxu0  ;;  %v1640_v21 = vpop.f32.mrf.mxu1 }
 0x65a   :  { %v1645_v14 = vadd.f32 %v1569_v17, %v4172_v56  ;;  %v1647_v32 = vadd.f32 %v1640_v21, %v4174_v47 }
 0x65b   :  { %v1571_v4 = vpop.f32.mrf.mxu0  ;;  %v1642_v9 = vpop.f32.mrf.mxu1 }
 0x65c   :  { %v2285_v23 = vmul.f32 -1.442695, %v1645_v14  ;;  %v1646_v35 = vadd.f32 %v1571_v4, %v4173_v8  ;;  %v2287_v27 = vmul.f32 -1.442695, %v1647_v32  ;;  %v1648_v60 = vadd.f32 %v1642_v9, %v4175_v44  ;;  %v2073_v44 = vld [vmem:[#allocation13 + $0xf0] sm:$0xff] }
 0x65e   :  { %2388 = vpow2.f32 %v2285_v23  ;;  %v2286_v48 = vmul.f32 -1.442695, %v1646_v35 }
 0x660   :  { %2390 = vpow2.f32 %v2286_v48 }
 0x661   :  { %2392 = vpow2.f32 %v2287_v27 }
 0x662   :  { %2394 = vtanh.f32 %v1648_v60 }
 0x66b   :  { %v2389_v0 = vpop.eup %2388 }
 0x66c   :  { %v1658_v36 = vadd.f32 1.0, %v2389_v0  ;;  %v2072_v0 = vld [vmem:[#allocation13 + $0xe8] sm:$0xff] }
 0x66d   :  { %v2391_v25 = vpop.eup %2390 }
 0x66e   :  { %2396 = vrcp.f32 %v1658_v36  ;;  %v1659_v17 = vadd.f32 1.0, %v2391_v25  ;;  %v2393_v14 = vpop.eup %2392  ;;  %v2071_v25 = vld [vmem:[#allocation13 + $0xe0] sm:$0xff] }
 0x66f   :  { %v2395_v56 = vpop.eup %2394  ;;  %v1660_v8 = vadd.f32 1.0, %v2393_v14  ;;  %v2069_v14 = vld [vmem:[#allocation13 + $0xd0] sm:$0xff] }
 0x670   :  { %2398 = vrcp.f32 %v1659_v17  ;;  %v2070_v17 = vld [vmem:[#allocation13 + $0xd8] sm:$0xff] }
 0x671   :  { %2400 = vrcp.f32 %v1660_v8  ;;  %v2064_v8 = vld [vmem:[#allocation13 + $0xa8] sm:$0xff] }
 0x67b   :  { %v2397_v23 = vpop.eup %2396 }
 0x67c   :  { %v1669_v35 = vmul.f32 %v2397_v23, %v2395_v56  ;;  %v2068_v56 = vld [vmem:[#allocation13 + $0xc8] sm:$0xff]  ;;  %v2067_v23 = vld [vmem:[#allocation13 + $0xc0] sm:$0xff] }
 0x67d   :  { %v2399_v4 = vpop.eup %2398 }
 0x67e   :  { %v1668_v47 = vmul.f32 %v2399_v4, %v3675_v24  ;;  %v2401_v9 = vpop.eup %2400  ;;  %v2065_v4 = vld [vmem:[#allocation13 + $0xb0] sm:$0xff] }
 0x680   :  { %v3753_v48 = vadd.f32 %v1669_v35, %v1668_v47  ;;  %v2066_v35 = vld [vmem:[#allocation13 + $0xb8] sm:$0xff]  ;;  %v2063_v47 = vld [vmem:[#allocation13 + $0xa0] sm:$0xff] }
 0x682   :  { %2402 = vtanh.f32 %v3753_v48 }
 0x68f   :  { %v2403_v27 = vpop.eup %2402 }
 0x690   :  { %v3756_v32 = vmul.f32 %v2403_v27, %v2401_v9  ;;  %v2061_v9 = vld [vmem:[#allocation13 + $0x90] sm:$0xff]  ;;  %v2060_v27 = vld [vmem:[#allocation13 + $0x88] sm:$0xff] }
 0x692   :  { %1747 = vmatmul.mubr.f32.vlgmr.msra.gmra.mxu0 %v3756_v32  ;;  %1818 = vmatmul.mubr.f32.vlgmr.msra.gmra.mxu1 %v3756_v32 }
 0x693   :  { %1862 = vmatpush1.msra.mxu0 %v3400_v38  ;;  %1933 = vmatpush1.msra.mxu1 %v3543_v26  ;;  %v4176_v38 = vld [vmem:[#allocation34_spill] sm:$0xff] }
 0x694   :  { %1863 = vmatprep.subr.mxu0 %v3404_v15  ;;  %1934 = vmatprep.subr.mxu1 %v3547_v43  ;;  %v4177_v15 = vld [vmem:[#allocation30_spill] sm:$0xff]  ;;  %v4195_v43 = vld [vmem:[#allocation79_spill] sm:$0xff] }
 0x695   :  { %1864 = vmatpush1.msra.mxu0 %v3408_v45  ;;  %1935 = vmatpush1.msra.mxu1 %v3551_v18  ;;  %v4178_v45 = vld [vmem:[#allocation45_spill] sm:$0xff] }
 0x696   :  { %1865 = vmatprep.subr.mxu0 %v3412_v50  ;;  %1936 = vmatprep.subr.mxu1 %v3555_v19  ;;  %v4179_v50 = vld [vmem:[#allocation31_spill] sm:$0xff] }
 0x697   :  { %1866 = vmatpush1.msra.mxu0 %v3416_v49  ;;  %1937 = vmatpush1.msra.mxu1 %v3559_v46  ;;  %v4180_v49 = vld [vmem:[#allocation35_spill] sm:$0xff] }
 0x698   :  { %1867 = vmatprep.subr.mxu0 %v3420_v51  ;;  %1938 = vmatprep.subr.mxu1 %v3563_v40  ;;  %v4181_v51 = vld [vmem:[#allocation32_spill] sm:$0xff] }
 0x699   :  { %1868 = vmatpush1.msra.mxu0 %v3424_v52  ;;  %1939 = vmatpush1.msra.mxu1 %v3567_v41  ;;  %v4182_v52 = vld [vmem:[#allocation46_spill] sm:$0xff]  ;;  %v4196_v40 = vld [vmem:[#allocation64_spill] sm:$0xff] }
 0x69a   :  { %1869 = vmatprep.subr.mxu0 %v3428_v53  ;;  %1940 = vmatprep.subr.mxu1 %v3571_v16  ;;  %v4183_v53 = vld [vmem:[#allocation25_spill] sm:$0xff] }
 0x69b   :  { %1870 = vmatpush1.msra.mxu0 %v3432_v54  ;;  %1941 = vmatpush1.msra.mxu1 %v3575_v34  ;;  %v4184_v54 = vld [vmem:[#allocation36_spill] sm:$0xff] }
 0x69c   :  { %1871 = vmatprep.subr.mxu0 %v3436_v59  ;;  %1942 = vmatprep.subr.mxu1 %v3579_v42  ;;  %v4185_v59 = vld [vmem:[#allocation69_spill] sm:$0xff] }
 0x69d   :  { %1872 = vmatpush1.msra.mxu0 %v3440_v57  ;;  %1943 = vmatpush1.msra.mxu1 %v3583_v31  ;;  %v4186_v57 = vld [vmem:[#allocation47_spill] sm:$0xff]  ;;  %v4197_v42 = vld [vmem:[#allocation65_spill] sm:$0xff] }
 0x69e   :  { %1873 = vmatprep.subr.mxu0 %v3444_v61  ;;  %1944 = vmatprep.subr.mxu1 %v3587_v39  ;;  %v4187_v61 = vld [vmem:[#allocation54_spill] sm:$0xff] }
 0x69f   :  { %1874 = vmatpush1.msra.mxu0 %v3448_v3  ;;  %1945 = vmatpush1.msra.mxu1 %v3591_v12  ;;  %v4188_v3 = vld [vmem:[#allocation37_spill] sm:$0xff] }
 0x6a0   :  { %1875 = vmatprep.subr.mxu0 %v3452_v5  ;;  %1946 = vmatprep.subr.mxu1 %v3595_v58  ;;  %v4189_v5 = vld [vmem:[#allocation55_spill] sm:$0xff] }
 0x6a1   :  { %1876 = vmatpush1.msra.mxu0 %v3456_v62  ;;  %1947 = vmatpush1.msra.mxu1 %v3599_v63  ;;  %v4190_v62 = vld [vmem:[#allocation48_spill] sm:$0xff] }
 0x6a2   :  { %1877 = vmatprep.subr.mxu0 %v3460_v11  ;;  %1948 = vmatprep.subr.mxu1 %v3603_v2  ;;  %v4191_v11 = vld [vmem:[#allocation43_spill] sm:$0xff] }
 0x6a3   :  { %1878 = vmatpush1.msra.mxu0 %v3464_v13  ;;  %1949 = vmatpush1.msra.mxu1 %v3607_v7  ;;  %v4192_v13 = vmov 0.0  }
 0x6a4   :  { %1879 = vmatprep.subr.mxu0 %v3468_v20  ;;  %1950 = vmatprep.subr.mxu1 %v3611_v10  ;;  %v4193_v20 = vld [vmem:[#allocation38_spill] sm:$0xff] }
 0x6a5   :  { %1880 = vmatpush1.msra.mxu0 %v3472_v1  ;;  %1951 = vmatpush1.msra.mxu1 %v3615_v29  ;;  %v2074_v1 = vld [vmem:[#allocation13 + $0xf8] sm:$0xff] }
 0x6a6   :  { %1881 = vmatprep.subr.mxu0 %v3476_v22  ;;  %1952 = vmatprep.subr.mxu1 %v3619_v33 }
 0x6a7   :  { %1882 = vmatpush1.msra.mxu0 %v3480_v6  ;;  %1953 = vmatpush1.msra.mxu1 %v3623_v37  ;;  %v4194_v6 = vld [vmem:[#allocation78_spill] sm:$0xff] }
 0x6a8   :  { %1883 = vmatprep.subr.mxu0 %v3484_v28  ;;  %1954 = vmatprep.subr.mxu1 %v3627_v55 }
 0x6a9   :  { %1884 = vmatpush1.msra.mxu0 %v3488_v30  ;;  %1955 = vmatpush1.msra.mxu1 %v4176_v38  ;;  %v2059_v38 = vld [vmem:[#allocation13 + $0x80] sm:$0xff] }
 0x6aa   :  { %1885 = vmatprep.subr.mxu0 %v4177_v15  ;;  %1956 = vmatprep.subr.mxu1 %v4178_v45  ;;  %v2058_v15 = vld [vmem:[#allocation13 + $0x78] sm:$0xff]  ;;  %v2057_v45 = vld [vmem:[#allocation13 + $0x70] sm:$0xff] }
 0x6ab   :  { %1886 = vmatpush1.msra.mxu0 %v4179_v50  ;;  %1957 = vmatpush1.msra.mxu1 %v4180_v49  ;;  %v2056_v50 = vld [vmem:[#allocation13 + $0x68] sm:$0xff]  ;;  %v2055_v49 = vld [vmem:[#allocation13 + $0x60] sm:$0xff] }
 0x6ac   :  { %1887 = vmatprep.subr.mxu0 %v4181_v51  ;;  %1958 = vmatprep.subr.mxu1 %v4182_v52  ;;  %v2054_v51 = vld [vmem:[#allocation13 + $0x58] sm:$0xff]  ;;  %v2053_v52 = vld [vmem:[#allocation13 + $0x50] sm:$0xff] }
 0x6ad   :  { %1888 = vmatpush1.msra.mxu0 %v4183_v53  ;;  %1959 = vmatpush1.msra.mxu1 %v4184_v54  ;;  %v2052_v53 = vld [vmem:[#allocation13 + $0x48] sm:$0xff]  ;;  %v2051_v54 = vld [vmem:[#allocation13 + $0x40] sm:$0xff] }
 0x6ae   :  { %1889 = vmatprep.subr.mxu0 %v4185_v59  ;;  %1960 = vmatprep.subr.mxu1 %v4186_v57  ;;  %v2050_v59 = vld [vmem:[#allocation13 + $0x38] sm:$0xff]  ;;  %v2049_v57 = vld [vmem:[#allocation13 + $0x30] sm:$0xff] }
 0x6af   :  { %1890 = vmatpush1.msra.mxu0 %v4187_v61  ;;  %1961 = vmatpush1.msra.mxu1 %v4188_v3  ;;  %v2048_v61 = vld [vmem:[#allocation13 + $0x28] sm:$0xff]  ;;  %v2047_v3 = vld [vmem:[#allocation13 + $0x20] sm:$0xff] }
 0x6b0   :  { %1891 = vmatprep.subr.mxu0 %v4189_v5  ;;  %1962 = vmatprep.subr.mxu1 %v4190_v62  ;;  %v2046_v5 = vld [vmem:[#allocation13 + $0x18] sm:$0xff]  ;;  %v2045_v62 = vld [vmem:[#allocation13 + $0x10] sm:$0xff] }
 0x6b1   :  { %1892 = vmatpush1.msra.mxu0 %v4191_v11  ;;  %1925 = vmatprep.mubr.f32.mxu0 %v4192_v13  ;;  %v2044_v11 = vld [vmem:[#allocation13 + $0x8] sm:$0xff] }
 0x6b2   :  { %1963 = vmatpush1.msra.mxu1 %v4193_v20  ;;  %1996 = vmatprep.mubr.f32.mxu1 %v4192_v13  ;;  %v2043_v20 = vld [vmem:[#allocation13] sm:$0xff] }
 0x6b3   :  { %2087 = vmatprep.subr.mxu0 %v2074_v1  ;;  %v4198_v1 = vld [vmem:[#allocation81_spill] sm:$0xff] }
 0x752   :  { %v1748_v22 = vpop.f32.mrf.mxu0  ;;  %v1819_v46 = vpop.f32.mrf.mxu1 }
 0x753   :  { %v1824_v28 = vadd.f32 %v1748_v22, %v4194_v6  ;;  %v1826_v41 = vadd.f32 %v1819_v46, %v4196_v40  ;;  %v4199_v22 = vld [vmem:[#allocation27_spill] sm:$0xff]  ;;  %v4200_v6 = vld [vmem:[#allocation29_spill] sm:$0xff]  ;;  %v4205_v46 = vld [vmem:[#allocation80_spill] sm:$0xff] }
 0x754   :  { %v1750_v30 = vpop.f32.mrf.mxu0  ;;  %v1821_v16 = vpop.f32.mrf.mxu1 }
 0x755   :  { %v2288_v26 = vmul.f32 -1.442695, %v1824_v28  ;;  %v1825_v18 = vadd.f32 %v1750_v30, %v4195_v43  ;;  %v2290_v34 = vmul.f32 -1.442695, %v1826_v41  ;;  %v1827_v31 = vadd.f32 %v1821_v16, %v4197_v42  ;;  %v4201_v28 = vld [vmem:[#allocation44_spill] sm:$0xff]  ;;  %v4202_v30 = vld [vmem:[#allocation49_spill] sm:$0xff] }
 0x756   :  { %v4203_v43 = vld [vmem:[#allocation68_spill] sm:$0xff] }
 0x757   :  { %2404 = vpow2.f32 %v2288_v26  ;;  %v2289_v19 = vmul.f32 -1.442695, %v1825_v18  ;;  %v4204_v18 = vld [vmem:[#allocation26_spill] sm:$0xff] }
 0x759   :  { %2406 = vpow2.f32 %v2289_v19  ;;  %v389_v19 = vadd.f32 %v4204_v18, %v4203_v43 }
 0x75a   :  { %2408 = vpow2.f32 %v2290_v34 }
 0x75b   :  { %2410 = vtanh.f32 %v1827_v31 }
 0x764   :  { %v2405_v39 = vpop.eup %2404 }
 0x765   :  { %v1837_v12 = vadd.f32 1.0, %v2405_v39 }
 0x766   :  { %v2407_v58 = vpop.eup %2406 }
 0x767   :  { %2412 = vrcp.f32 %v1837_v12  ;;  %v1838_v63 = vadd.f32 1.0, %v2407_v58  ;;  %v2409_v2 = vpop.eup %2408 }
 0x768   :  { %v2411_v7 = vpop.eup %2410  ;;  %v1839_v37 = vadd.f32 1.0, %v2409_v2 }
 0x769   :  { %2414 = vrcp.f32 %v1838_v63  ;;  %v4207_v63 = vld [vmem:[#allocation67_spill] sm:$0xff] }
 0x76a   :  { %2416 = vrcp.f32 %v1839_v37  ;;  %v4208_v37 = vld [vmem:[#allocation53_spill] sm:$0xff] }
 0x774   :  { %v2413_v10 = vpop.eup %2412 }
 0x775   :  { %v1848_v29 = vmul.f32 %v2413_v10, %v2411_v7 }
 0x776   :  { %v2415_v33 = vpop.eup %2414 }
 0x777   :  { %v1847_v55 = vmul.f32 %v2415_v33, %v3753_v48  ;;  %v2417_v36 = vpop.eup %2416  ;;  %v2062_v48 = vld [vmem:[#allocation13 + $0x98] sm:$0xff]  ;;  %v2075_v33 = vld [vmem:[%s3903_s7] sm:$0x3]  ;;  %s2703_s7 = smov [#allocation16]  }
 0x778   :  { %s2234_s22 = sshll.u32 %s2703_s7, 4  ;;  %s2235_s22 = int_to_ptr.vmem [resolvable:$true] %s2234_s22 }
 0x779   :  { %v3829_v24 = vadd.f32 %v1848_v29, %v1847_v55  ;;  %v4209_v55 = vsub.s32 0, %v4208_v37  ;;  %s2620_s25 = scalar_lea.vmem %s2235_s22, 128  ;;  %p2625_p3 = scmp.lt.s32.totalorder %s2235_s22, %s2235_s22 }
 0x77a   :  { %p2621_p2 = scmp.ne.s32.totalorder %s2235_s22, %s2620_s25  ;;  %p2626_p4 = scmp.lt.s32.totalorder %s2620_s25, %s2620_s25 }
 0x77b   :  { %2418 = vtanh.f32 %v3829_v24 }
 0x77c   :  { %p2627_p5 = por %p2626_p4, %p2625_p3 }
 0x77e   :  { %p2628_p6 = pnand %p2627_p5, %p2621_p2 }
 0x788   :  { %v2419_v60 = vpop.eup %2418 }
 0x789   :  { %v3832_v21 = vmul.f32 %v2419_v60, %v2417_v36  ;;  %v3861_v36 = vrot.slane %v2075_v33, %v4209_v55  ;;  %v4210_v60 = vsub.s32 1, %v4208_v37 }
 0x78b   :  { %1926 = vmatmul.mubr.f32.vlgmr.msra.gmra.mxu0 %v3832_v21  ;;  %1997 = vmatmul.mubr.f32.vlgmr.msra.gmra.mxu1 %v3832_v21 }
 0x78c   :  { %2088 = vmatpush1.msra.mxu0 %v2073_v44  ;;  %2151 = vmatprep.mubr.f32.mxu0 %v4192_v13 }
 0x78d   :  { %2089 = vmatprep.subr.mxu0 %v2072_v0 }
 0x78e   :  { %2090 = vmatpush1.msra.mxu0 %v2071_v25 }
 0x78f   :  { %2091 = vmatprep.subr.mxu0 %v2070_v17 }
 0x790   :  { %2092 = vmatpush1.msra.mxu0 %v2069_v14 }
 0x791   :  { %2093 = vmatprep.subr.mxu0 %v2068_v56 }
 0x792   :  { %2094 = vmatpush1.msra.mxu0 %v2067_v23 }
 0x793   :  { %2095 = vmatprep.subr.mxu0 %v2066_v35 }
 0x794   :  { %2096 = vmatpush1.msra.mxu0 %v2065_v4 }
 0x795   :  { %2097 = vmatprep.subr.mxu0 %v2064_v8 }
 0x796   :  { %2098 = vmatpush1.msra.mxu0 %v2063_v47 }
 0x797   :  { %2099 = vmatprep.subr.mxu0 %v2062_v48 }
 0x798   :  { %2100 = vmatpush1.msra.mxu0 %v2061_v9 }
 0x799   :  { %2101 = vmatprep.subr.mxu0 %v2060_v27 }
 0x79a   :  { %2102 = vmatpush1.msra.mxu0 %v2059_v38 }
 0x79b   :  { %2103 = vmatprep.subr.mxu0 %v2058_v15 }
 0x79c   :  { %2104 = vmatpush1.msra.mxu0 %v2057_v45 }
 0x79d   :  { %2105 = vmatprep.subr.mxu0 %v2056_v50 }
 0x79e   :  { %2106 = vmatpush1.msra.mxu0 %v2055_v49 }
 0x79f   :  { %2107 = vmatprep.subr.mxu0 %v2054_v51 }
 0x7a0   :  { %2108 = vmatpush1.msra.mxu0 %v2053_v52 }
 0x7a1   :  { %2109 = vmatprep.subr.mxu0 %v2052_v53 }
 0x7a2   :  { %2110 = vmatpush1.msra.mxu0 %v2051_v54 }
 0x7a3   :  { %2111 = vmatprep.subr.mxu0 %v2050_v59 }
 0x7a4   :  { %2112 = vmatpush1.msra.mxu0 %v2049_v57 }
 0x7a5   :  { %2113 = vmatprep.subr.mxu0 %v2048_v61 }
 0x7a6   :  { %2114 = vmatpush1.msra.mxu0 %v2047_v3 }
 0x7a7   :  { %2115 = vmatprep.subr.mxu0 %v2046_v5 }
 0x7a8   :  { %2116 = vmatpush1.msra.mxu0 %v2045_v62 }
 0x7a9   :  { %2117 = vmatprep.subr.mxu0 %v2044_v11 }
 0x7aa   :  { %2118 = vmatpush1.msra.mxu0 %v2043_v20 }
 0x7ab   :  { %2152 = vmatmul.mubr.f32.vlgmr.msra.gmra.mxu0 %v4198_v1 }
 0x7ac   :  { %2157 = vmatprep.mubr.f32.mxu0 %v4192_v13 }
 0x7af   :  { %2158 = vmatmul.mubr.f32.gmra.mxu0 %v4199_v22 }
 0x7b0   :  { %2163 = vmatprep.mubr.f32.mxu0 %v4192_v13 }
 0x7b3   :  { %2164 = vmatmul.mubr.f32.gmra.mxu0 %v4200_v6 }
 0x7b4   :  { %2169 = vmatprep.mubr.f32.mxu0 %v4192_v13 }
 0x7b7   :  { %2170 = vmatmul.mubr.f32.gmra.mxu0 %v4201_v28 }
 0x7b8   :  { %2175 = vmatprep.mubr.f32.mxu0 %v4192_v13 }
 0x7bb   :  { %2176 = vmatmul.mubr.f32.gmra.mxu0 %v4202_v30 }
 0x7bc   :  { %2181 = vmatprep.mubr.f32.mxu0 %v4192_v13 }
 0x7bf   :  { %2182 = vmatmul.mubr.f32.gmra.mxu0 %v3756_v32  ;;  %v4206_v32 = vld [vmem:[#allocation66_spill] sm:$0xff] }
 0x7c0   :  { %2187 = vmatprep.mubr.f32.mxu0 %v4192_v13 }
 0x7c3   :  { %2188 = vmatmul.mubr.f32.gmra.mxu0 %v3832_v21  ;;  %v3865_v21 = vrot.slane %v2075_v33, %v4210_v60 }
 0x7c4   :  { %2193 = vmatprep.mubr.f32.mxu0 %v4192_v13 }
 0x84b   :  { %v1927_v26 = vpop.f32.mrf.mxu0  ;;  %v1998_v31 = vpop.f32.mrf.mxu1 }
 0x84c   :  { %v2003_v40 = vadd.f32 %v1927_v26, %v4205_v46  ;;  %v2005_v39 = vadd.f32 %v1998_v31, %v4206_v32 }
 0x84d   :  { %v1929_v41 = vpop.f32.mrf.mxu0  ;;  %v2000_v12 = vpop.f32.mrf.mxu1 }
 0x84e   :  { %v2291_v16 = vmul.f32 -1.442695, %v2003_v40  ;;  %v2004_v34 = vadd.f32 %v1929_v41, %v389_v19  ;;  %v2293_v58 = vmul.f32 -1.442695, %v2005_v39  ;;  %v2006_v2 = vadd.f32 %v2000_v12, %v4207_v63 }
 0x850   :  { %2420 = vpow2.f32 %v2291_v16  ;;  %v2292_v42 = vmul.f32 -1.442695, %v2004_v34 }
 0x852   :  { %2422 = vpow2.f32 %v2292_v42 }
 0x853   :  { %2424 = vpow2.f32 %v2293_v58 }
 0x854   :  { %2426 = vtanh.f32 %v2006_v2 }
 0x85d   :  { %v2421_v13 = vpop.eup %2420 }
 0x85e   :  { %v2016_v7 = vadd.f32 1.0, %v2421_v13 }
 0x85f   :  { %v2423_v10 = vpop.eup %2422 }
 0x860   :  { %2428 = vrcp.f32 %v2016_v7  ;;  %v2017_v29 = vadd.f32 1.0, %v2423_v10  ;;  %v2425_v44 = vpop.eup %2424 }
 0x861   :  { %v2427_v25 = vpop.eup %2426  ;;  %v2018_v8 = vadd.f32 1.0, %v2425_v44 }
 0x862   :  { %2430 = vrcp.f32 %v2017_v29 }
 0x863   :  { %2432 = vrcp.f32 %v2018_v8 }
 0x86b   :  { %v2153_v0 = vpop.f32.mrf.mxu0 }
 0x86c   :  { %v2154_v17 = vadd.f32 %v2153_v0, %v3861_v36 }
 0x86d   :  { %v2429_v14 = vpop.eup %2428  ;;  %v2155_v56 = vpop.f32.mrf.mxu0 }
 0x86e   :  { %v2027_v23 = vmul.f32 %v2429_v14, %v2427_v25  ;;  %2200 = vst [vmem:[#allocation15] sm:$0xff] %v2154_v17  ;;  %v2156_v35 = vadd.f32 %v2155_v56, %v3865_v21 }
 0x86f   :  { %v2431_v4 = vpop.eup %2430  ;;  %v2159_v47 = vpop.f32.mrf.mxu0 }
 0x870   :  { %v2026_v48 = vmul.f32 %v2431_v4, %v3829_v24  ;;  %2201 = vst [vmem:[#allocation15 + $0x8] sm:$0xff] %v2156_v35  ;;  %v2160_v9 = vadd.f32 %v2159_v47, %v3861_v36  ;;  %v2433_v62 = vpop.eup %2432 }
 0x871   :  { %v2161_v27 = vpop.f32.mrf.mxu0 }
 0x872   :  { %v2028_v38 = vadd.f32 %v2027_v23, %v2026_v48  ;;  %2202 = vst [vmem:[#allocation15 + $0x10] sm:$0xff] %v2160_v9  ;;  %v2162_v15 = vadd.f32 %v2161_v27, %v3865_v21 }
 0x873   :  { %v2165_v45 = vpop.f32.mrf.mxu0 }
 0x874   :  { %2034 = vst [vmem:[#allocation18] sm:$0xff] %v2028_v38  ;;  %2203 = vst [vmem:[#allocation15 + $0x18] sm:$0xff] %v2162_v15  ;;  %v2166_v50 = vadd.f32 %v2165_v45, %v3861_v36  ;;  %2434 = vtanh.f32 %v2028_v38 }
 0x875   :  { %v2167_v49 = vpop.f32.mrf.mxu0 }
 0x876   :  { %2204 = vst [vmem:[#allocation15 + $0x20] sm:$0xff] %v2166_v50  ;;  %v2168_v51 = vadd.f32 %v2167_v49, %v3865_v21 }
 0x877   :  { %v2171_v24 = vpop.f32.mrf.mxu0 }
 0x878   :  { %2205 = vst [vmem:[#allocation15 + $0x28] sm:$0xff] %v2168_v51  ;;  %v2172_v52 = vadd.f32 %v2171_v24, %v3861_v36 }
 0x879   :  { %v2173_v53 = vpop.f32.mrf.mxu0 }
 0x87a   :  { %2206 = vst [vmem:[#allocation15 + $0x30] sm:$0xff] %v2172_v52  ;;  %v2174_v54 = vadd.f32 %v2173_v53, %v3865_v21 }
 0x87b   :  { %v2177_v59 = vpop.f32.mrf.mxu0 }
 0x87c   :  { %2207 = vst [vmem:[#allocation15 + $0x38] sm:$0xff] %v2174_v54  ;;  %v2178_v57 = vadd.f32 %v2177_v59, %v3861_v36 }
 0x87d   :  { %v2179_v61 = vpop.f32.mrf.mxu0 }
 0x87e   :  { %2208 = vst [vmem:[#allocation15 + $0x40] sm:$0xff] %v2178_v57  ;;  %v2180_v3 = vadd.f32 %v2179_v61, %v3865_v21 }
 0x87f   :  { %v2183_v5 = vpop.f32.mrf.mxu0 }
 0x880   :  { %2209 = vst [vmem:[#allocation15 + $0x48] sm:$0xff] %v2180_v3  ;;  %v2184_v11 = vadd.f32 %v2183_v5, %v3861_v36 }
 0x881   :  { %v2435_v20 = vpop.eup %2434  ;;  %v2185_v1 = vpop.f32.mrf.mxu0 }
 0x882   :  { %2210 = vst [vmem:[#allocation15 + $0x50] sm:$0xff] %v2184_v11  ;;  %v2186_v22 = vadd.f32 %v2185_v1, %v3865_v21  ;;  %v2030_v6 = vmul.f32 %v2435_v20, %v2433_v62 }
 0x883   :  { %v2189_v28 = vpop.f32.mrf.mxu0 }
 0x884   :  { %2211 = vst [vmem:[#allocation15 + $0x58] sm:$0xff] %v2186_v22  ;;  %v2190_v30 = vadd.f32 %v2189_v28, %v3861_v36  ;;  %2194 = vmatmul.mubr.f32.gmra.mxu0 %v2030_v6  ;;  %2033 = vst [vmem:[#allocation16] sm:$0xff] %v2030_v6 }
 0x885   :  { %v2191_v26 = vpop.f32.mrf.mxu0 }
 0x886   :  { %2212 = vst [vmem:[#allocation15 + $0x60] sm:$0xff] %v2190_v30  ;;  %v2192_v43 = vadd.f32 %v2191_v26, %v3865_v21 }
 0x888   :  { %2213 = vst [vmem:[#allocation15 + $0x68] sm:$0xff] %v2192_v43 }
 0x889   :  { %2631 = shalt.err (!%p2628_p6)
}
 0x88a   :  { %2237 = dma.vmem_to_hbm [thread:$0]  %s2235_s22, 128, %s3905_s9, [#allocation17]  }
 0x88b   :  { %s2704_s29 = smov [#allocation18]  }
 0x88c   :  { %s2244_s30 = sshll.u32 %s2704_s29, 4  ;;  %s2245_s30 = int_to_ptr.vmem [resolvable:$true] %s2244_s30 }
 0x88d   :  { %s2640_s3 = scalar_lea.vmem %s2245_s30, 128  ;;  %p2645_p8 = scmp.lt.s32.totalorder %s2245_s30, %s2245_s30 }
 0x88e   :  { %p2641_p7 = scmp.ne.s32.totalorder %s2245_s30, %s2640_s3  ;;  %p2646_p9 = scmp.lt.s32.totalorder %s2640_s3, %s2640_s3 }
 0x890   :  { %p2647_p10 = por %p2646_p9, %p2645_p8 }
 0x892   :  { %p2648_p11 = pnand %p2647_p10, %p2641_p7 }
 0x894   :  { %2651 = shalt.err (!%p2648_p11)
}
 0x895   :  { %2247 = dma.vmem_to_hbm [thread:$0]  %s2245_s30, 128, %s3906_s10, [#allocation17]  }
 0x896   :  { %s2705_s13 = smov [#allocation15]  }
 0x897   :  { %s2221_s14 = sshll.u32 %s2705_s13, 4  ;;  %s2222_s14 = int_to_ptr.vmem [resolvable:$true] %s2221_s14 }
 0x898   :  { %s2660_s9 = scalar_lea.vmem %s2222_s14, 2048  ;;  %p2665_p13 = scmp.lt.s32.totalorder %s2222_s14, %s2222_s14 }
 0x899   :  { %p2661_p12 = scmp.ne.s32.totalorder %s2222_s14, %s2660_s9  ;;  %p2666_p0 = scmp.lt.s32.totalorder %s2660_s9, %s2660_s9 }
 0x89b   :  { %p2667_p1 = por %p2666_p0, %p2665_p13 }
 0x89d   :  { %p2668_p2 = pnand %p2667_p1, %p2661_p12 }
 0x944   :  { %v2195_v18 = vpop.f32.mrf.mxu0 }
 0x945   :  { %v2196_v19 = vadd.f32 %v2195_v18, %v3861_v36 }
 0x946   :  { %v2197_v46 = vpop.f32.mrf.mxu0 }
 0x947   :  { %2214 = vst [vmem:[#allocation15 + $0x70] sm:$0xff] %v2196_v19  ;;  %v2198_v40 = vadd.f32 %v2197_v46, %v3865_v21 }
 0x949   :  { %2215 = vst [vmem:[#allocation15 + $0x78] sm:$0xff] %v2198_v40 }
 0x94a   :  { %2671 = shalt.err (!%p2668_p2)
}
 0x94b   :  { %2227 = dma.vmem_to_hbm [thread:$0]  %s2222_s14, 2048, %s3904_s8, [#allocation6], %s2697_s27, %s2697_s27, %s2698_s28  }
 0x94c   :  { %2688 = dma.done.wait [#allocation6], 2048  }
 0x94d   :  { %2689 = vsyncadd [#allocation6], 4294965248 }
 0x94e   :  { %2690 = dma.done.wait [#allocation17], 256  }
 0x94f   :  { %2691 = vsyncadd [#allocation17], 4294967040 }
 0x950   :  { %2257 = vsyncpa [#allocation5], 1 }
 0x951   :  { %2258 = vsyncpa [#allocation8], 1 }
 0x952   :  { %2259 = vsyncpa [#allocation11], 1 }
 0x953   :  { %2260 = vsyncpa [#allocation14], 1 }
 0x954   :  { %2261 = vsyncpa [#allocation6], 1 }
 0x955   :  { %2262 = vsyncpa [#allocation17], 1 }

</bundles_post_ra>
